<compile_context>
chip_gen: v6e
topology: v6e:2x2x1
jax: 0.10.0
libtpu: 0.0.40
codegen_flags: <defaults>
</compile_context>

<pallas_src>
import functools

import jax
import jax.numpy as jnp
from jax.experimental import pallas as pl
from jax.experimental.pallas import tpu as pltpu


# Storage / MXU dtypes. Accumulation, biases, h/c state and gate elementwise math
# stay f32. Set all three to jnp.float32 for a bit-tight reference check.
ACT_DTYPE = jnp.bfloat16      # inter-kernel activation storage
WEIGHT_DTYPE = jnp.bfloat16   # matmul weight storage (biases stay f32)
MATMUL_DTYPE = jnp.bfloat16   # MXU operand dtype


def _vmem_limit(nbytes, headroom=1.5):
    # ~20-50% headroom over the block/scratch estimate, clamped to what v7x has.
    return int(min(max(headroom * nbytes, 4 << 20), 64 << 20))


# ----------------------------- dense kernel ---------------------------------
def _linear_kernel(x_ref, w_ref, b_ref, o_ref, *, relu_in, relu_out):
    x = x_ref[...]
    if relu_in:
        x = jnp.maximum(x, 0.0)
    y = jnp.dot(x.astype(MATMUL_DTYPE), w_ref[...].astype(MATMUL_DTYPE),
                preferred_element_type=jnp.float32) + b_ref[...]
    if relu_out:
        y = jnp.maximum(y, 0.0)
    o_ref[...] = y.astype(o_ref.dtype)


def linear(x, w, b, *, relu_in=False, relu_out=False, out_dtype=jnp.float32,
           block_rows=256, block_cols=512):
    # x: (N, D_in); w: (D_in, D_out); b: (1, D_out)
    n, d_in = x.shape
    d_out = w.shape[1]
    tm = min(block_rows, n)
    tn = min(block_cols, d_out)
    grid = (pl.cdiv(n, tm), pl.cdiv(d_out, tn))

    xb = x.dtype.itemsize
    wb = w.dtype.itemsize
    ob = jnp.dtype(out_dtype).itemsize
    vmem = _vmem_limit(2 * (tm * d_in * xb + d_in * tn * wb + tn * 4 + tm * tn * ob)
                       + tm * tn * 4)

    kernel = functools.partial(_linear_kernel, relu_in=relu_in, relu_out=relu_out)
    return pl.pallas_call(
        kernel,
        out_shape=jax.ShapeDtypeStruct((n, d_out), out_dtype),
        grid=grid,
        in_specs=[
            pl.BlockSpec((tm, d_in), lambda i, j: (i, 0)),
            pl.BlockSpec((d_in, tn), lambda i, j: (0, j)),
            pl.BlockSpec((1, tn), lambda i, j: (0, j)),
        ],
        out_specs=pl.BlockSpec((tm, tn), lambda i, j: (i, j)),
        compiler_params=pltpu.CompilerParams(
            dimension_semantics=("parallel", "parallel"),
            vmem_limit_bytes=vmem),
        cost_estimate=pl.CostEstimate(
            flops=int(2 * n * d_in * d_out),
            transcendentals=0,
            bytes_accessed=int(xb * n * d_in + wb * d_in * d_out
                               + 4 * d_out + ob * n * d_out)),
    )(x, w, b)


# --------------- fused, time-chunked bidirectional recurrence ----------------
def _bilstm_chunk_kernel(x_ref, wih_ref, whh_ref, b_ref, h_out_ref,
                         gx_scr, h_scr, c_scr):
    # x_ref    : (K, Tc*B, Dp)   layer input rows (time-major) for this time chunk
    # wih_ref  : (1, K, Dp, 4H)  this direction's W_ih, split per input piece
    # whh_ref  : (1, H, 4H)      this direction's recurrent weights
    # b_ref    : (1, 1, 4H)      combined b_ih + b_hh for this direction (f32)
    # h_out_ref: (1, Tc, B, H)   hidden states, written at ORIGINAL time indices
    # gx_scr   : (Tc, B, 4H) f32 per-chunk hoisted input projection
    # h_scr/c_scr: (B, H) f32    recurrent state, carried across time chunks
    d = pl.program_id(0)                       # 0 = forward, 1 = backward
    c = pl.program_id(1)                       # time-chunk step
    K = x_ref.shape[0]
    _, Tc, B, H = h_out_ref.shape

    @pl.when(c == 0)
    def _():                                   # fresh state at each direction's first chunk
        h_scr[...] = jnp.zeros_like(h_scr)
        c_scr[...] = jnp.zeros_like(c_scr)

    # Hoisted input projection for the whole chunk: one big MXU matmul per piece,
    # bias folded once.  Never materialized in HBM.
    acc = jnp.dot(x_ref[0].astype(MATMUL_DTYPE), wih_ref[0, 0].astype(MATMUL_DTYPE),
                  preferred_element_type=jnp.float32)
    for k in range(1, K):
        acc = acc + jnp.dot(x_ref[k].astype(MATMUL_DTYPE),
                            wih_ref[0, k].astype(MATMUL_DTYPE),
                            preferred_element_type=jnp.float32)
    gxc = acc + b_ref[0]                       # (Tc*B, 4H) f32
    for t in range(Tc):                        # static scatter into (Tc, B, 4H) scratch
        gx_scr[t] = gxc[t * B:(t + 1) * B, :]

    whh = whh_ref[0].astype(MATMUL_DTYPE)      # loop-invariant, hoisted

    def step(t, carry):
        # Backward direction walks the chunk in reverse; combined with the reversed
        # chunk index_map the store lands at the ORIGINAL time index.
        tt = t + d * (Tc - 1 - 2 * t)
        gates = gx_scr[tt] + jnp.dot(h_scr[...].astype(MATMUL_DTYPE), whh,
                                     preferred_element_type=jnp.float32)   # (B, 4H)
        # Gate order (i, f, o, g): one contiguous sigmoid slab + one tanh slab.
        sig = jax.nn.sigmoid(gates[:, :3 * H])
        i_g = sig[:, 0 * H:1 * H]
        f_g = sig[:, 1 * H:2 * H]
        o_g = sig[:, 2 * H:3 * H]
        g_g = jnp.tanh(gates[:, 3 * H:])
        c_new = f_g * c_scr[...] + i_g * g_g
        h_new = o_g * jnp.tanh(c_new)
        c_scr[...] = c_new
        h_scr[...] = h_new
        h_out_ref[0, tt] = h_new.astype(h_out_ref.dtype)
        return carry

    jax.lax.fori_loop(0, Tc, step, 0, unroll=min(4, Tc))


def _pick_time_chunk(T, B, target, row_align):
    # Largest divisor of T <= target that keeps the flattened (Tc*B) row block
    # sublane-aligned for ACT_DTYPE; fall back to the full sequence (block rows
    # equal to the full array rows is always a legal block shape).
    for tc in range(min(target, T), 0, -1):
        if T % tc == 0 and (tc * B) % row_align == 0:
            return tc
    return T


def bilstm_layer(x_flat, w_ih, w_hh, b, T, *, time_chunk=32):
    # x_flat: (K, T*B, Dp) time-major rows; w_ih: (2, K, Dp, 4H);
    # w_hh: (2, H, 4H); b: (2, 1, 4H)  ->  (2, T, B, H) hidden states (ACT_DTYPE)
    K, TB, Dp = x_flat.shape
    B = TB // T
    H = w_hh.shape[1]
    G = 4 * H

    row_align = 16 if jnp.dtype(x_flat.dtype).itemsize == 2 else 8
    Tc = _pick_time_chunk(T, B, time_chunk, row_align)
    nc = T // Tc

    # Pure-integer index maps; backward direction (d=1) consumes chunks back-to-front.
    def x_map(d, c):
        return (0, c + d * (nc - 1 - 2 * c), 0)

    def out_map(d, c):
        return (d, c + d * (nc - 1 - 2 * c), 0, 0)

    act_b = jnp.dtype(ACT_DTYPE).itemsize
    w_b = jnp.dtype(WEIGHT_DTYPE).itemsize
    in_b = x_flat.dtype.itemsize
    block_bytes = 2 * (K * Tc * B * Dp * in_b + K * Dp * G * w_b + H * G * w_b
                       + G * 4 + Tc * B * H * act_b)
    scratch_bytes = Tc * B * G * 4 + 2 * B * H * 4
    vmem = _vmem_limit(block_bytes + scratch_bytes)

    return pl.pallas_call(
        _bilstm_chunk_kernel,
        out_shape=jax.ShapeDtypeStruct((2, T, B, H), ACT_DTYPE),
        grid=(2, nc),
        in_specs=[
            pl.BlockSpec((K, Tc * B, Dp), x_map),
            pl.BlockSpec((1, K, Dp, G), lambda d, c: (d, 0, 0, 0)),
            pl.BlockSpec((1, H, G), lambda d, c: (d, 0, 0)),
            pl.BlockSpec((1, 1, G), lambda d, c: (d, 0, 0)),
        ],
        out_specs=pl.BlockSpec((1, Tc, B, H), out_map),
        scratch_shapes=[
            pltpu.VMEM((Tc, B, G), jnp.float32),   # per-chunk gates_x
            pltpu.VMEM((B, H), jnp.float32),       # h state (carried across chunks)
            pltpu.VMEM((B, H), jnp.float32),       # c state (carried across chunks)
        ],
        # direction axis independent (one direction per TensorCore on v7x);
        # time-chunk axis carries h/c state -> arbitrary.
        compiler_params=pltpu.CompilerParams(
            dimension_semantics=("parallel", "arbitrary"),
            vmem_limit_bytes=vmem),
        cost_estimate=pl.CostEstimate(
            flops=int(2 * (2 * T * B * K * Dp * G + T * (2 * B * H * G + 12 * B * H))),
            transcendentals=int(2 * T * 5 * B * H),
            bytes_accessed=int(in_b * 2 * K * T * B * Dp
                               + w_b * 2 * (K * Dp * G + H * G)
                               + 4 * 2 * G + act_b * 2 * T * B * H)),
    )(x_flat, w_ih, w_hh, b)


# ------------------------------ full model ----------------------------------
def model_forward(params, input_seq, *, time_chunk=32):
    # input_seq: (B, T) int32 token ids
    B, T = input_seq.shape
    # time-major embedding gather (plain-JAX glue); avoids a (B,T,E)->(T,B,E) copy
    emb = jnp.take(params["emb"], input_seq.T, axis=0)          # (T, B, E)
    E = emb.shape[-1]
    enc = linear(emb.reshape(T * B, E), params["enc_w"], params["enc_b"],
                 relu_out=True, out_dtype=ACT_DTYPE)             # relu(encoder); dropout1 = id

    x = enc[None]                                                # (K=1, T*B, ENC)
    h = None
    for lp in params["lstm"]:
        H = lp["w_hh"].shape[1]
        h = bilstm_layer(x, lp["w_ih"], lp["w_hh"], lp["b"], T,
                         time_chunk=time_chunk)                  # (2, T, B, H)
        x = h.reshape(2, T * B, H)                               # next layer input (no concat)

    # lstm_out[:, -1] == [h_fwd(T-1), h_bwd(T-1)] — tiny (B, 2H) concat
    last = jnp.concatenate([h[0, T - 1], h[1, T - 1]], axis=-1)
    h1 = linear(last, params["lin1_w"], params["lin1_b"],
                relu_in=True, out_dtype=ACT_DTYPE)
    out = linear(h1, params["lin2_w"], params["lin2_b"],
                 relu_in=True, out_dtype=jnp.float32)            # dropout2 = id
    return out                                                   # (B, dictionary_size)


# ------------------------- pure-JAX reference (check) ------------------------
def _f32(a):
    return a.astype(jnp.float32)


def _ref_lstm_dir(x_tbd, w_ih, w_hh, b):
    H = w_hh.shape[0]
    B = x_tbd.shape[1]

    def step(carry, x_t):
        h, c = carry
        g = x_t @ w_ih + h @ w_hh + b[0]
        i = jax.nn.sigmoid(g[:, :H])
        f = jax.nn.sigmoid(g[:, H:2 * H])
        o = jax.nn.sigmoid(g[:, 2 * H:3 * H])
        gg = jnp.tanh(g[:, 3 * H:])
        c = f * c + i * gg
        h = o * jnp.tanh(c)
        return (h, c), h

    _, hs = jax.lax.scan(step, (jnp.zeros((B, H)), jnp.zeros((B, H))), x_tbd)
    return hs


def ref_forward(params, input_seq):
    emb = jnp.take(params["emb"], input_seq, axis=0)             # (B, T, E)
    enc = jax.nn.relu(emb @ _f32(params["enc_w"]) + params["enc_b"][0])
    x = jnp.transpose(enc, (1, 0, 2))                            # (T, B, ENC)
    for lp in params["lstm"]:
        G = lp["w_hh"].shape[2]
        outs = []
        for d in range(2):
            w_ih = _f32(lp["w_ih"][d]).reshape(-1, G)            # (K*Dp, 4H)
            w_hh = _f32(lp["w_hh"][d])
            b = lp["b"][d]
            xd = x if d == 0 else x[::-1]
            hs = _ref_lstm_dir(xd, w_ih, w_hh, b)
            if d == 1:
                hs = hs[::-1]
            outs.append(hs)
        x = jnp.concatenate(outs, axis=-1)
    last = jax.nn.relu(x[-1])
    h1 = last @ _f32(params["lin1_w"]) + params["lin1_b"][0]
    return jax.nn.relu(h1) @ _f32(params["lin2_w"]) + params["lin2_b"][0]


# ------------------------------- params init --------------------------------
def init_params(key, dict_size, emb_dim, enc_dim, hidden, num_layers, lin_dim):
    keys = iter(jax.random.split(key, 128))

    def nrm(shape, scale=0.05, dtype=WEIGHT_DTYPE):
        return (scale * jax.random.normal(next(keys), shape)).astype(dtype)

    params = {
        "emb": nrm((dict_size, emb_dim), 0.1, jnp.float32),
        "enc_w": nrm((emb_dim, enc_dim)),
        "enc_b": nrm((1, enc_dim), dtype=jnp.float32),
        "lstm": [],
        "lin1_w": nrm((2 * hidden, lin_dim)),
        "lin1_b": nrm((1, lin_dim), dtype=jnp.float32),
        "lin2_w": nrm((lin_dim, dict_size)),
        "lin2_b": nrm((1, dict_size), dtype=jnp.float32),
    }
    for layer in range(num_layers):
        if layer == 0:
            k_pieces, d_piece = 1, enc_dim
        else:
            k_pieces, d_piece = 2, hidden          # fwd / bwd halves of previous layer
        params["lstm"].append({
            # NOTE: gate packing is (i, f, o, g).  PyTorch packs (i, f, g, o) —
            # repack the last axis accordingly if importing trained weights.
            "w_ih": nrm((2, k_pieces, d_piece, 4 * hidden)),   # stacked over direction
            "w_hh": nrm((2, hidden, 4 * hidden)),
            "b": nrm((2, 1, 4 * hidden), dtype=jnp.float32),   # b_ih + b_hh combined
        })
    return params


if __name__ == "__main__":
    DICT, EMB, ENC, HID, NLAYERS, LIN = 64, 32, 32, 32, 2, 64
    B, T = 4, 8

    key = jax.random.PRNGKey(0)
    kp, kx = jax.random.split(key)
    params = init_params(kp, DICT, EMB, ENC, HID, NLAYERS, LIN)
    input_seq = jax.random.randint(kx, (B, T), 0, DICT, dtype=jnp.int32)

    # time_chunk=4 -> 2 chunks per direction: exercises the chunked recurrence,
    # the h/c carry across chunks and the reversed backward chunk order.
    fwd = jax.jit(functools.partial(model_forward, time_chunk=4))
    out = jax.block_until_ready(fwd(params, input_seq))

    ref = ref_forward(params, input_seq)
    assert out.shape == (B, DICT)
    max_err = float(jnp.max(jnp.abs(out - ref)))
    assert jnp.allclose(out, ref, atol=2e-2, rtol=2e-2), (
        f"mismatch vs JAX reference (max abs err {max_err})")

    print("KERNEL_OK")
</pallas_src>

<mosaic_0001>
module attributes {stable_mosaic.version = 11 : i64} {
  func.func @_linear_kernel(%arg0: i32, %arg1: i32, %arg2: memref<32x32xf32, #tpu.memory_space<vmem>>, %arg3: memref<32x32xbf16, #tpu.memory_space<vmem>>, %arg4: memref<1x32xf32, #tpu.memory_space<vmem>>, %arg5: memref<32x32xbf16, #tpu.memory_space<vmem>>) attributes {dimension_semantics = [#tpu.dimension_semantics<parallel>, #tpu.dimension_semantics<parallel>], iteration_bounds = array<i64: 1, 1>, scalar_prefetch = 0 : i64, scratch_operands = 0 : i64, tpu.core_type = #tpu.core_type<tc>, window_params = [{transform_indices = @transform_0, window_bounds = array<i64: 32, 32>}, {transform_indices = @transform_1, window_bounds = array<i64: 32, 32>}, {transform_indices = @transform_2, window_bounds = array<i64: 1, 32>}, {transform_indices = @transform_3, window_bounds = array<i64: 32, 32>}]} {
    %c0 = arith.constant 0 : index
    %c0_0 = arith.constant 0 : index
    %0 = vector.load %arg2[%c0, %c0_0] : memref<32x32xf32, #tpu.memory_space<vmem>>, vector<32x32xf32>
    %1 = arith.truncf %0 : vector<32x32xf32> to vector<32x32xbf16>
    %c0_1 = arith.constant 0 : index
    %c0_2 = arith.constant 0 : index
    %2 = vector.load %arg3[%c0_1, %c0_2] : memref<32x32xbf16, #tpu.memory_space<vmem>>, vector<32x32xbf16>
    %cst = arith.constant dense<0.000000e+00> : vector<32x32xf32>
    %3 = tpu.matmul %1, %2, %cst {dimension_numbers = #tpu.dot_dimension_numbers<[1], [0], [0], [1], [0, 0, 1, 1], [], []>} : vector<32x32xbf16>, vector<32x32xbf16>, vector<32x32xf32> -> vector<32x32xf32>
    %c0_3 = arith.constant 0 : index
    %c0_4 = arith.constant 0 : index
    %4 = vector.load %arg4[%c0_3, %c0_4] : memref<1x32xf32, #tpu.memory_space<vmem>>, vector<1x32xf32>
    %5 = vector.broadcast %4 : vector<1x32xf32> to vector<32x32xf32>
    %6 = arith.addf %3, %5 : vector<32x32xf32>
    %cst_5 = arith.constant 0.000000e+00 : f32
    %7 = vector.broadcast %cst_5 : f32 to vector<32x32xf32>
    %8 = arith.maximumf %6, %7 : vector<32x32xf32>
    %9 = arith.truncf %8 : vector<32x32xf32> to vector<32x32xbf16>
    %c0_6 = arith.constant 0 : index
    %c0_7 = arith.constant 0 : index
    %10 = vector.load %arg5[%c0_6, %c0_7] : memref<32x32xbf16, #tpu.memory_space<vmem>>, vector<32x32xbf16>
    tpu.vector_store %arg5[%c0_6, %c0_7], %9 {strides = array<i32>} : memref<32x32xbf16, #tpu.memory_space<vmem>>, vector<32x32xbf16>,
    return
  }
  func.func @transform_0(%arg0: i32, %arg1: i32) -> (i32, i32) {
    %c0_i32 = arith.constant 0 : i32
    %c0_i32_0 = arith.constant 0 : i32
    return %arg0, %c0_i32 : i32, i32
  }
  func.func @transform_1(%arg0: i32, %arg1: i32) -> (i32, i32) {
    %c0_i32 = arith.constant 0 : i32
    %c0_i32_0 = arith.constant 0 : i32
    return %c0_i32, %arg1 : i32, i32
  }
  func.func @transform_2(%arg0: i32, %arg1: i32) -> (i32, i32) {
    %c0_i32 = arith.constant 0 : i32
    %c0_i32_0 = arith.constant 0 : i32
    return %c0_i32, %arg1 : i32, i32
  }
  func.func @transform_3(%arg0: i32, %arg1: i32) -> (i32, i32) {
    %c0_i32 = arith.constant 0 : i32
    return %arg0, %arg1 : i32, i32
  }
}

module attributes {stable_mosaic.version = 11 : i64} {
  func.func @_linear_kernel(%arg0: i32, %arg1: i32, %arg2: memref<4x64xbf16, #tpu.memory_space<vmem>>, %arg3: memref<64x64xbf16, #tpu.memory_space<vmem>>, %arg4: memref<1x64xf32, #tpu.memory_space<vmem>>, %arg5: memref<4x64xbf16, #tpu.memory_space<vmem>>) attributes {dimension_semantics = [#tpu.dimension_semantics<parallel>, #tpu.dimension_semantics<parallel>], iteration_bounds = array<i64: 1, 1>, scalar_prefetch = 0 : i64, scratch_operands = 0 : i64, tpu.core_type = #tpu.core_type<tc>, window_params = [{transform_indices = @transform_0, window_bounds = array<i64: 4, 64>}, {transform_indices = @transform_1, window_bounds = array<i64: 64, 64>}, {transform_indices = @transform_2, window_bounds = array<i64: 1, 64>}, {transform_indices = @transform_3, window_bounds = array<i64: 4, 64>}]} {
    %c0 = arith.constant 0 : index
    %c0_0 = arith.constant 0 : index
    %0 = vector.load %arg2[%c0, %c0_0] : memref<4x64xbf16, #tpu.memory_space<vmem>>, vector<4x64xbf16>
    %cst = arith.constant 0.000000e+00 : bf16
    %1 = vector.broadcast %cst : bf16 to vector<4x64xbf16>
    %2 = arith.maximumf %0, %1 : vector<4x64xbf16>
    %c0_1 = arith.constant 0 : index
    %c0_2 = arith.constant 0 : index
    %3 = vector.load %arg3[%c0_1, %c0_2] : memref<64x64xbf16, #tpu.memory_space<vmem>>, vector<64x64xbf16>
    %cst_3 = arith.constant dense<0.000000e+00> : vector<4x64xf32>
    %4 = tpu.matmul %2, %3, %cst_3 {dimension_numbers = #tpu.dot_dimension_numbers<[1], [0], [0], [1], [0, 0, 1, 1], [], []>} : vector<4x64xbf16>, vector<64x64xbf16>, vector<4x64xf32> -> vector<4x64xf32>
    %c0_4 = arith.constant 0 : index
    %c0_5 = arith.constant 0 : index
    %5 = vector.load %arg4[%c0_4, %c0_5] : memref<1x64xf32, #tpu.memory_space<vmem>>, vector<1x64xf32>
    %6 = vector.broadcast %5 : vector<1x64xf32> to vector<4x64xf32>
    %7 = arith.addf %4, %6 : vector<4x64xf32>
    %8 = arith.truncf %7 : vector<4x64xf32> to vector<4x64xbf16>
    %c0_6 = arith.constant 0 : index
    %c0_7 = arith.constant 0 : index
    %9 = vector.load %arg5[%c0_6, %c0_7] : memref<4x64xbf16, #tpu.memory_space<vmem>>, vector<4x64xbf16>
    tpu.vector_store %arg5[%c0_6, %c0_7], %8 {strides = array<i32>} : memref<4x64xbf16, #tpu.memory_space<vmem>>, vector<4x64xbf16>,
    return
  }
  func.func @transform_0(%arg0: i32, %arg1: i32) -> (i32, i32) {
    %c0_i32 = arith.constant 0 : i32
    %c0_i32_0 = arith.constant 0 : i32
    return %arg0, %c0_i32 : i32, i32
  }
  func.func @transform_1(%arg0: i32, %arg1: i32) -> (i32, i32) {
    %c0_i32 = arith.constant 0 : i32
    %c0_i32_0 = arith.constant 0 : i32
    return %c0_i32, %arg1 : i32, i32
  }
  func.func @transform_2(%arg0: i32, %arg1: i32) -> (i32, i32) {
    %c0_i32 = arith.constant 0 : i32
    %c0_i32_0 = arith.constant 0 : i32
    return %c0_i32, %arg1 : i32, i32
  }
  func.func @transform_3(%arg0: i32, %arg1: i32) -> (i32, i32) {
    %c0_i32 = arith.constant 0 : i32
    return %arg0, %arg1 : i32, i32
  }
}

module attributes {stable_mosaic.version = 11 : i64} {
  func.func @_bilstm_chunk_kernel(%arg0: i32, %arg1: i32, %arg2: memref<2x16x32xbf16, #tpu.memory_space<vmem>>, %arg3: memref<1x2x32x128xbf16, #tpu.memory_space<vmem>>, %arg4: memref<1x32x128xbf16, #tpu.memory_space<vmem>>, %arg5: memref<1x1x128xf32, #tpu.memory_space<vmem>>, %arg6: memref<1x4x4x32xbf16, #tpu.memory_space<vmem>>, %arg7: memref<4x4x128xf32, #tpu.memory_space<vmem>>, %arg8: memref<4x32xf32, #tpu.memory_space<vmem>>, %arg9: memref<4x32xf32, #tpu.memory_space<vmem>>) attributes {dimension_semantics = [#tpu.dimension_semantics<parallel>, #tpu.dimension_semantics<arbitrary>], iteration_bounds = array<i64: 2, 2>, scalar_prefetch = 0 : i64, scratch_operands = 3 : i64, tpu.core_type = #tpu.core_type<tc>, window_params = [{transform_indices = @transform_0, window_bounds = array<i64: 2, 16, 32>}, {transform_indices = @transform_1, window_bounds = array<i64: 1, 2, 32, 128>}, {transform_indices = @transform_2, window_bounds = array<i64: 1, 32, 128>}, {transform_indices = @transform_3, window_bounds = array<i64: 1, 1, 128>}, {transform_indices = @transform_4, window_bounds = array<i64: 1, 4, 4, 32>}]} {
    %c0_i32 = arith.constant 0 : i32
    %0 = arith.cmpi eq, %arg1, %c0_i32 : i32
    %1 = arith.extui %0 : i1 to i32
    %c0_i32_0 = arith.constant 0 : i32
    %2 = arith.cmpi ne, %1, %c0_i32_0 : i32
    scf.if %2 {
      %cst_99 = arith.constant 0.000000e+00 : f32
      %176 = vector.broadcast %cst_99 : f32 to vector<4x32xf32>
      %c0_100 = arith.constant 0 : index
      %c0_101 = arith.constant 0 : index
      %177 = vector.load %arg8[%c0_100, %c0_101] : memref<4x32xf32, #tpu.memory_space<vmem>>, vector<4x32xf32>
      tpu.vector_store %arg8[%c0_100, %c0_101], %176 {strides = array<i32>} : memref<4x32xf32, #tpu.memory_space<vmem>>, vector<4x32xf32>,
      %cst_102 = arith.constant 0.000000e+00 : f32
      %178 = vector.broadcast %cst_102 : f32 to vector<4x32xf32>
      %c0_103 = arith.constant 0 : index
      %c0_104 = arith.constant 0 : index
      %179 = vector.load %arg9[%c0_103, %c0_104] : memref<4x32xf32, #tpu.memory_space<vmem>>, vector<4x32xf32>
      tpu.vector_store %arg9[%c0_103, %c0_104], %178 {strides = array<i32>} : memref<4x32xf32, #tpu.memory_space<vmem>>, vector<4x32xf32>,
    } else {
    }
    %c0 = arith.constant 0 : index
    %c0_1 = arith.constant 0 : index
    %c0_2 = arith.constant 0 : index
    %3 = vector.load %arg2[%c0, %c0_1, %c0_2] : memref<2x16x32xbf16, #tpu.memory_space<vmem>>, vector<1x16x32xbf16>
    %4 = vector.shape_cast %3 : vector<1x16x32xbf16> to vector<16x32xbf16>
    %c0_3 = arith.constant 0 : index
    %c0_4 = arith.constant 0 : index
    %c0_5 = arith.constant 0 : index
    %c0_6 = arith.constant 0 : index
    %5 = vector.load %arg3[%c0_3, %c0_4, %c0_5, %c0_6] : memref<1x2x32x128xbf16, #tpu.memory_space<vmem>>, vector<1x1x32x128xbf16>
    %6 = vector.shape_cast %5 : vector<1x1x32x128xbf16> to vector<32x128xbf16>
    %cst = arith.constant dense<0.000000e+00> : vector<16x128xf32>
    %7 = tpu.matmul %4, %6, %cst {dimension_numbers = #tpu.dot_dimension_numbers<[1], [0], [0], [1], [0, 0, 1, 1], [], []>} : vector<16x32xbf16>, vector<32x128xbf16>, vector<16x128xf32> -> vector<16x128xf32>
    %c1 = arith.constant 1 : index
    %c0_7 = arith.constant 0 : index
    %c0_8 = arith.constant 0 : index
    %8 = vector.load %arg2[%c1, %c0_7, %c0_8] : memref<2x16x32xbf16, #tpu.memory_space<vmem>>, vector<1x16x32xbf16>
    %9 = vector.shape_cast %8 : vector<1x16x32xbf16> to vector<16x32xbf16>
    %c0_9 = arith.constant 0 : index
    %c1_10 = arith.constant 1 : index
    %c0_11 = arith.constant 0 : index
    %c0_12 = arith.constant 0 : index
    %10 = vector.load %arg3[%c0_9, %c1_10, %c0_11, %c0_12] : memref<1x2x32x128xbf16, #tpu.memory_space<vmem>>, vector<1x1x32x128xbf16>
    %11 = vector.shape_cast %10 : vector<1x1x32x128xbf16> to vector<32x128xbf16>
    %cst_13 = arith.constant dense<0.000000e+00> : vector<16x128xf32>
    %12 = tpu.matmul %9, %11, %cst_13 {dimension_numbers = #tpu.dot_dimension_numbers<[1], [0], [0], [1], [0, 0, 1, 1], [], []>} : vector<16x32xbf16>, vector<32x128xbf16>, vector<16x128xf32> -> vector<16x128xf32>
    %13 = arith.addf %7, %12 : vector<16x128xf32>
    %c0_14 = arith.constant 0 : index
    %c0_15 = arith.constant 0 : index
    %c0_16 = arith.constant 0 : index
    %14 = vector.load %arg5[%c0_14, %c0_15, %c0_16] : memref<1x1x128xf32, #tpu.memory_space<vmem>>, vector<1x1x128xf32>
    %15 = vector.shape_cast %14 : vector<1x1x128xf32> to vector<1x128xf32>
    %16 = vector.broadcast %15 : vector<1x128xf32> to vector<16x128xf32>
    %17 = arith.addf %13, %16 : vector<16x128xf32>
    %18 = vector.extract_strided_slice %17 {offsets = [0, 0], sizes = [4, 128], strides = [1, 1]} : vector<16x128xf32> to vector<4x128xf32>
    %c0_17 = arith.constant 0 : index
    %c0_18 = arith.constant 0 : index
    %c0_19 = arith.constant 0 : index
    %19 = vector.load %arg7[%c0_17, %c0_18, %c0_19] : memref<4x4x128xf32, #tpu.memory_space<vmem>>, vector<1x4x128xf32>
    %20 = vector.shape_cast %19 : vector<1x4x128xf32> to vector<4x128xf32>
    %21 = vector.shape_cast %18 : vector<4x128xf32> to vector<1x4x128xf32>
    tpu.vector_store %arg7[%c0_17, %c0_18, %c0_19], %21 {strides = array<i32>} : memref<4x4x128xf32, #tpu.memory_space<vmem>>, vector<1x4x128xf32>,
    %22 = vector.extract_strided_slice %17 {offsets = [4, 0], sizes = [4, 128], strides = [1, 1]} : vector<16x128xf32> to vector<4x128xf32>
    %c1_20 = arith.constant 1 : index
    %c0_21 = arith.constant 0 : index
    %c0_22 = arith.constant 0 : index
    %23 = vector.load %arg7[%c1_20, %c0_21, %c0_22] : memref<4x4x128xf32, #tpu.memory_space<vmem>>, vector<1x4x128xf32>
    %24 = vector.shape_cast %23 : vector<1x4x128xf32> to vector<4x128xf32>
    %25 = vector.shape_cast %22 : vector<4x128xf32> to vector<1x4x128xf32>
    tpu.vector_store %arg7[%c1_20, %c0_21, %c0_22], %25 {strides = array<i32>} : memref<4x4x128xf32, #tpu.memory_space<vmem>>, vector<1x4x128xf32>,
    %26 = vector.extract_strided_slice %17 {offsets = [8, 0], sizes = [4, 128], strides = [1, 1]} : vector<16x128xf32> to vector<4x128xf32>
    %c2 = arith.constant 2 : index
    %c0_23 = arith.constant 0 : index
    %c0_24 = arith.constant 0 : index
    %27 = vector.load %arg7[%c2, %c0_23, %c0_24] : memref<4x4x128xf32, #tpu.memory_space<vmem>>, vector<1x4x128xf32>
    %28 = vector.shape_cast %27 : vector<1x4x128xf32> to vector<4x128xf32>
    %29 = vector.shape_cast %26 : vector<4x128xf32> to vector<1x4x128xf32>
    tpu.vector_store %arg7[%c2, %c0_23, %c0_24], %29 {strides = array<i32>} : memref<4x4x128xf32, #tpu.memory_space<vmem>>, vector<1x4x128xf32>,
    %30 = vector.extract_strided_slice %17 {offsets = [12, 0], sizes = [4, 128], strides = [1, 1]} : vector<16x128xf32> to vector<4x128xf32>
    %c3 = arith.constant 3 : index
    %c0_25 = arith.constant 0 : index
    %c0_26 = arith.constant 0 : index
    %31 = vector.load %arg7[%c3, %c0_25, %c0_26] : memref<4x4x128xf32, #tpu.memory_space<vmem>>, vector<1x4x128xf32>
    %32 = vector.shape_cast %31 : vector<1x4x128xf32> to vector<4x128xf32>
    %33 = vector.shape_cast %30 : vector<4x128xf32> to vector<1x4x128xf32>
    tpu.vector_store %arg7[%c3, %c0_25, %c0_26], %33 {strides = array<i32>} : memref<4x4x128xf32, #tpu.memory_space<vmem>>, vector<1x4x128xf32>,
    %c0_27 = arith.constant 0 : index
    %c0_28 = arith.constant 0 : index
    %c0_29 = arith.constant 0 : index
    %34 = vector.load %arg4[%c0_27, %c0_28, %c0_29] : memref<1x32x128xbf16, #tpu.memory_space<vmem>>, vector<1x32x128xbf16>
    %35 = vector.shape_cast %34 : vector<1x32x128xbf16> to vector<32x128xbf16>
    %c0_i32_30 = arith.constant 0 : i32
    %c2_i32 = arith.constant 2 : i32
    %36 = arith.muli %c2_i32, %c0_i32_30 : i32
    %c3_i32 = arith.constant 3 : i32
    %37 = arith.subi %c3_i32, %36 : i32
    %38 = arith.muli %arg0, %37 : i32
    %39 = arith.addi %c0_i32_30, %38 : i32
    %40 = arith.index_cast %39 : i32 to index
    %c0_31 = arith.constant 0 : index
    %c0_32 = arith.constant 0 : index
    %41 = vector.load %arg7[%40, %c0_31, %c0_32] : memref<4x4x128xf32, #tpu.memory_space<vmem>>, vector<1x4x128xf32>
    %42 = vector.shape_cast %41 : vector<1x4x128xf32> to vector<4x128xf32>
    %c0_33 = arith.constant 0 : index
    %c0_34 = arith.constant 0 : index
    %43 = vector.load %arg8[%c0_33, %c0_34] : memref<4x32xf32, #tpu.memory_space<vmem>>, vector<4x32xf32>
    %44 = arith.truncf %43 : vector<4x32xf32> to vector<4x32xbf16>
    %cst_35 = arith.constant dense<0.000000e+00> : vector<4x128xf32>
    %45 = tpu.matmul %44, %35, %cst_35 {dimension_numbers = #tpu.dot_dimension_numbers<[1], [0], [0], [1], [0, 0, 1, 1], [], []>} : vector<4x32xbf16>, vector<32x128xbf16>, vector<4x128xf32> -> vector<4x128xf32>
    %46 = arith.addf %42, %45 : vector<4x128xf32>
    %47 = vector.extract_strided_slice %46 {offsets = [0, 0], sizes = [4, 96], strides = [1, 1]} : vector<4x128xf32> to vector<4x96xf32>
    %48 = arith.negf %47 : vector<4x96xf32>
    %49 = math.exp %48 : vector<4x96xf32>
    %cst_36 = arith.constant 1.000000e+00 : f32
    %50 = vector.broadcast %cst_36 : f32 to vector<4x96xf32>
    %51 = arith.addf %50, %49 : vector<4x96xf32>
    %52 = arith.divf %50, %51 : vector<4x96xf32>
    %53 = vector.extract_strided_slice %52 {offsets = [0, 0], sizes = [4, 32], strides = [1, 1]} : vector<4x96xf32> to vector<4x32xf32>
    %54 = vector.extract_strided_slice %52 {offsets = [0, 32], sizes = [4, 32], strides = [1, 1]} : vector<4x96xf32> to vector<4x32xf32>
    %55 = vector.extract_strided_slice %52 {offsets = [0, 64], sizes = [4, 32], strides = [1, 1]} : vector<4x96xf32> to vector<4x32xf32>
    %56 = vector.extract_strided_slice %46 {offsets = [0, 96], sizes = [4, 32], strides = [1, 1]} : vector<4x128xf32> to vector<4x32xf32>
    %57 = math.tanh %56 : vector<4x32xf32>
    %c0_37 = arith.constant 0 : index
    %c0_38 = arith.constant 0 : index
    %58 = vector.load %arg9[%c0_37, %c0_38] : memref<4x32xf32, #tpu.memory_space<vmem>>, vector<4x32xf32>
    %59 = arith.mulf %54, %58 : vector<4x32xf32>
    %60 = arith.mulf %53, %57 : vector<4x32xf32>
    %61 = arith.addf %59, %60 : vector<4x32xf32>
    %62 = math.tanh %61 : vector<4x32xf32>
    %63 = arith.mulf %55, %62 : vector<4x32xf32>
    %c0_39 = arith.constant 0 : index
    %c0_40 = arith.constant 0 : index
    %64 = vector.load %arg9[%c0_39, %c0_40] : memref<4x32xf32, #tpu.memory_space<vmem>>, vector<4x32xf32>
    tpu.vector_store %arg9[%c0_39, %c0_40], %61 {strides = array<i32>} : memref<4x32xf32, #tpu.memory_space<vmem>>, vector<4x32xf32>,
    %c0_41 = arith.constant 0 : index
    %c0_42 = arith.constant 0 : index
    %65 = vector.load %arg8[%c0_41, %c0_42] : memref<4x32xf32, #tpu.memory_space<vmem>>, vector<4x32xf32>
    tpu.vector_store %arg8[%c0_41, %c0_42], %63 {strides = array<i32>} : memref<4x32xf32, #tpu.memory_space<vmem>>, vector<4x32xf32>,
    %66 = arith.truncf %63 : vector<4x32xf32> to vector<4x32xbf16>
    %c0_43 = arith.constant 0 : index
    %67 = arith.index_cast %39 : i32 to index
    %c0_44 = arith.constant 0 : index
    %c0_45 = arith.constant 0 : index
    %68 = vector.load %arg6[%c0_43, %67, %c0_44, %c0_45] : memref<1x4x4x32xbf16, #tpu.memory_space<vmem>>, vector<1x1x4x32xbf16>
    %69 = vector.shape_cast %68 : vector<1x1x4x32xbf16> to vector<4x32xbf16>
    %70 = vector.shape_cast %66 : vector<4x32xbf16> to vector<1x1x4x32xbf16>
    tpu.vector_store %arg6[%c0_43, %67, %c0_44, %c0_45], %70 {strides = array<i32>} : memref<1x4x4x32xbf16, #tpu.memory_space<vmem>>, vector<1x1x4x32xbf16>,
    %c1_i32 = arith.constant 1 : i32
    %c2_i32_46 = arith.constant 2 : i32
    %71 = arith.muli %c2_i32_46, %c1_i32 : i32
    %c3_i32_47 = arith.constant 3 : i32
    %72 = arith.subi %c3_i32_47, %71 : i32
    %73 = arith.muli %arg0, %72 : i32
    %74 = arith.addi %c1_i32, %73 : i32
    %75 = arith.index_cast %74 : i32 to index
    %c0_48 = arith.constant 0 : index
    %c0_49 = arith.constant 0 : index
    %76 = vector.load %arg7[%75, %c0_48, %c0_49] : memref<4x4x128xf32, #tpu.memory_space<vmem>>, vector<1x4x128xf32>
    %77 = vector.shape_cast %76 : vector<1x4x128xf32> to vector<4x128xf32>
    %c0_50 = arith.constant 0 : index
    %c0_51 = arith.constant 0 : index
    %78 = vector.load %arg8[%c0_50, %c0_51] : memref<4x32xf32, #tpu.memory_space<vmem>>, vector<4x32xf32>
    %79 = arith.truncf %78 : vector<4x32xf32> to vector<4x32xbf16>
    %cst_52 = arith.constant dense<0.000000e+00> : vector<4x128xf32>
    %80 = tpu.matmul %79, %35, %cst_52 {dimension_numbers = #tpu.dot_dimension_numbers<[1], [0], [0], [1], [0, 0, 1, 1], [], []>} : vector<4x32xbf16>, vector<32x128xbf16>, vector<4x128xf32> -> vector<4x128xf32>
    %81 = arith.addf %77, %80 : vector<4x128xf32>
    %82 = vector.extract_strided_slice %81 {offsets = [0, 0], sizes = [4, 96], strides = [1, 1]} : vector<4x128xf32> to vector<4x96xf32>
    %83 = arith.negf %82 : vector<4x96xf32>
    %84 = math.exp %83 : vector<4x96xf32>
    %cst_53 = arith.constant 1.000000e+00 : f32
    %85 = vector.broadcast %cst_53 : f32 to vector<4x96xf32>
    %86 = arith.addf %85, %84 : vector<4x96xf32>
    %87 = arith.divf %85, %86 : vector<4x96xf32>
    %88 = vector.extract_strided_slice %87 {offsets = [0, 0], sizes = [4, 32], strides = [1, 1]} : vector<4x96xf32> to vector<4x32xf32>
    %89 = vector.extract_strided_slice %87 {offsets = [0, 32], sizes = [4, 32], strides = [1, 1]} : vector<4x96xf32> to vector<4x32xf32>
    %90 = vector.extract_strided_slice %87 {offsets = [0, 64], sizes = [4, 32], strides = [1, 1]} : vector<4x96xf32> to vector<4x32xf32>
    %91 = vector.extract_strided_slice %81 {offsets = [0, 96], sizes = [4, 32], strides = [1, 1]} : vector<4x128xf32> to vector<4x32xf32>
    %92 = math.tanh %91 : vector<4x32xf32>
    %c0_54 = arith.constant 0 : index
    %c0_55 = arith.constant 0 : index
    %93 = vector.load %arg9[%c0_54, %c0_55] : memref<4x32xf32, #tpu.memory_space<vmem>>, vector<4x32xf32>
    %94 = arith.mulf %89, %93 : vector<4x32xf32>
    %95 = arith.mulf %88, %92 : vector<4x32xf32>
    %96 = arith.addf %94, %95 : vector<4x32xf32>
    %97 = math.tanh %96 : vector<4x32xf32>
    %98 = arith.mulf %90, %97 : vector<4x32xf32>
    %c0_56 = arith.constant 0 : index
    %c0_57 = arith.constant 0 : index
    %99 = vector.load %arg9[%c0_56, %c0_57] : memref<4x32xf32, #tpu.memory_space<vmem>>, vector<4x32xf32>
    tpu.vector_store %arg9[%c0_56, %c0_57], %96 {strides = array<i32>} : memref<4x32xf32, #tpu.memory_space<vmem>>, vector<4x32xf32>,
    %c0_58 = arith.constant 0 : index
    %c0_59 = arith.constant 0 : index
    %100 = vector.load %arg8[%c0_58, %c0_59] : memref<4x32xf32, #tpu.memory_space<vmem>>, vector<4x32xf32>
    tpu.vector_store %arg8[%c0_58, %c0_59], %98 {strides = array<i32>} : memref<4x32xf32, #tpu.memory_space<vmem>>, vector<4x32xf32>,
    %101 = arith.truncf %98 : vector<4x32xf32> to vector<4x32xbf16>
    %c0_60 = arith.constant 0 : index
    %102 = arith.index_cast %74 : i32 to index
    %c0_61 = arith.constant 0 : index
    %c0_62 = arith.constant 0 : index
    %103 = vector.load %arg6[%c0_60, %102, %c0_61, %c0_62] : memref<1x4x4x32xbf16, #tpu.memory_space<vmem>>, vector<1x1x4x32xbf16>
    %104 = vector.shape_cast %103 : vector<1x1x4x32xbf16> to vector<4x32xbf16>
    %105 = vector.shape_cast %101 : vector<4x32xbf16> to vector<1x1x4x32xbf16>
    tpu.vector_store %arg6[%c0_60, %102, %c0_61, %c0_62], %105 {strides = array<i32>} : memref<1x4x4x32xbf16, #tpu.memory_space<vmem>>, vector<1x1x4x32xbf16>,
    %c2_i32_63 = arith.constant 2 : i32
    %c2_i32_64 = arith.constant 2 : i32
    %106 = arith.muli %c2_i32_64, %c2_i32_63 : i32
    %c3_i32_65 = arith.constant 3 : i32
    %107 = arith.subi %c3_i32_65, %106 : i32
    %108 = arith.muli %arg0, %107 : i32
    %109 = arith.addi %c2_i32_63, %108 : i32
    %110 = arith.index_cast %109 : i32 to index
    %c0_66 = arith.constant 0 : index
    %c0_67 = arith.constant 0 : index
    %111 = vector.load %arg7[%110, %c0_66, %c0_67] : memref<4x4x128xf32, #tpu.memory_space<vmem>>, vector<1x4x128xf32>
    %112 = vector.shape_cast %111 : vector<1x4x128xf32> to vector<4x128xf32>
    %c0_68 = arith.constant 0 : index
    %c0_69 = arith.constant 0 : index
    %113 = vector.load %arg8[%c0_68, %c0_69] : memref<4x32xf32, #tpu.memory_space<vmem>>, vector<4x32xf32>
    %114 = arith.truncf %113 : vector<4x32xf32> to vector<4x32xbf16>
    %cst_70 = arith.constant dense<0.000000e+00> : vector<4x128xf32>
    %115 = tpu.matmul %114, %35, %cst_70 {dimension_numbers = #tpu.dot_dimension_numbers<[1], [0], [0], [1], [0, 0, 1, 1], [], []>} : vector<4x32xbf16>, vector<32x128xbf16>, vector<4x128xf32> -> vector<4x128xf32>
    %116 = arith.addf %112, %115 : vector<4x128xf32>
    %117 = vector.extract_strided_slice %116 {offsets = [0, 0], sizes = [4, 96], strides = [1, 1]} : vector<4x128xf32> to vector<4x96xf32>
    %118 = arith.negf %117 : vector<4x96xf32>
    %119 = math.exp %118 : vector<4x96xf32>
    %cst_71 = arith.constant 1.000000e+00 : f32
    %120 = vector.broadcast %cst_71 : f32 to vector<4x96xf32>
    %121 = arith.addf %120, %119 : vector<4x96xf32>
    %122 = arith.divf %120, %121 : vector<4x96xf32>
    %123 = vector.extract_strided_slice %122 {offsets = [0, 0], sizes = [4, 32], strides = [1, 1]} : vector<4x96xf32> to vector<4x32xf32>
    %124 = vector.extract_strided_slice %122 {offsets = [0, 32], sizes = [4, 32], strides = [1, 1]} : vector<4x96xf32> to vector<4x32xf32>
    %125 = vector.extract_strided_slice %122 {offsets = [0, 64], sizes = [4, 32], strides = [1, 1]} : vector<4x96xf32> to vector<4x32xf32>
    %126 = vector.extract_strided_slice %116 {offsets = [0, 96], sizes = [4, 32], strides = [1, 1]} : vector<4x128xf32> to vector<4x32xf32>
    %127 = math.tanh %126 : vector<4x32xf32>
    %c0_72 = arith.constant 0 : index
    %c0_73 = arith.constant 0 : index
    %128 = vector.load %arg9[%c0_72, %c0_73] : memref<4x32xf32, #tpu.memory_space<vmem>>, vector<4x32xf32>
    %129 = arith.mulf %124, %128 : vector<4x32xf32>
    %130 = arith.mulf %123, %127 : vector<4x32xf32>
    %131 = arith.addf %129, %130 : vector<4x32xf32>
    %132 = math.tanh %131 : vector<4x32xf32>
    %133 = arith.mulf %125, %132 : vector<4x32xf32>
    %c0_74 = arith.constant 0 : index
    %c0_75 = arith.constant 0 : index
    %134 = vector.load %arg9[%c0_74, %c0_75] : memref<4x32xf32, #tpu.memory_space<vmem>>, vector<4x32xf32>
    tpu.vector_store %arg9[%c0_74, %c0_75], %131 {strides = array<i32>} : memref<4x32xf32, #tpu.memory_space<vmem>>, vector<4x32xf32>,
    %c0_76 = arith.constant 0 : index
    %c0_77 = arith.constant 0 : index
    %135 = vector.load %arg8[%c0_76, %c0_77] : memref<4x32xf32, #tpu.memory_space<vmem>>, vector<4x32xf32>
    tpu.vector_store %arg8[%c0_76, %c0_77], %133 {strides = array<i32>} : memref<4x32xf32, #tpu.memory_space<vmem>>, vector<4x32xf32>,
    %136 = arith.truncf %133 : vector<4x32xf32> to vector<4x32xbf16>
    %c0_78 = arith.constant 0 : index
    %137 = arith.index_cast %109 : i32 to index
    %c0_79 = arith.constant 0 : index
    %c0_80 = arith.constant 0 : index
    %138 = vector.load %arg6[%c0_78, %137, %c0_79, %c0_80] : memref<1x4x4x32xbf16, #tpu.memory_space<vmem>>, vector<1x1x4x32xbf16>
    %139 = vector.shape_cast %138 : vector<1x1x4x32xbf16> to vector<4x32xbf16>
    %140 = vector.shape_cast %136 : vector<4x32xbf16> to vector<1x1x4x32xbf16>
    tpu.vector_store %arg6[%c0_78, %137, %c0_79, %c0_80], %140 {strides = array<i32>} : memref<1x4x4x32xbf16, #tpu.memory_space<vmem>>, vector<1x1x4x32xbf16>,
    %c3_i32_81 = arith.constant 3 : i32
    %c2_i32_82 = arith.constant 2 : i32
    %141 = arith.muli %c2_i32_82, %c3_i32_81 : i32
    %c3_i32_83 = arith.constant 3 : i32
    %142 = arith.subi %c3_i32_83, %141 : i32
    %143 = arith.muli %arg0, %142 : i32
    %144 = arith.addi %c3_i32_81, %143 : i32
    %145 = arith.index_cast %144 : i32 to index
    %c0_84 = arith.constant 0 : index
    %c0_85 = arith.constant 0 : index
    %146 = vector.load %arg7[%145, %c0_84, %c0_85] : memref<4x4x128xf32, #tpu.memory_space<vmem>>, vector<1x4x128xf32>
    %147 = vector.shape_cast %146 : vector<1x4x128xf32> to vector<4x128xf32>
    %c0_86 = arith.constant 0 : index
    %c0_87 = arith.constant 0 : index
    %148 = vector.load %arg8[%c0_86, %c0_87] : memref<4x32xf32, #tpu.memory_space<vmem>>, vector<4x32xf32>
    %149 = arith.truncf %148 : vector<4x32xf32> to vector<4x32xbf16>
    %cst_88 = arith.constant dense<0.000000e+00> : vector<4x128xf32>
    %150 = tpu.matmul %149, %35, %cst_88 {dimension_numbers = #tpu.dot_dimension_numbers<[1], [0], [0], [1], [0, 0, 1, 1], [], []>} : vector<4x32xbf16>, vector<32x128xbf16>, vector<4x128xf32> -> vector<4x128xf32>
    %151 = arith.addf %147, %150 : vector<4x128xf32>
    %152 = vector.extract_strided_slice %151 {offsets = [0, 0], sizes = [4, 96], strides = [1, 1]} : vector<4x128xf32> to vector<4x96xf32>
    %153 = arith.negf %152 : vector<4x96xf32>
    %154 = math.exp %153 : vector<4x96xf32>
    %cst_89 = arith.constant 1.000000e+00 : f32
    %155 = vector.broadcast %cst_89 : f32 to vector<4x96xf32>
    %156 = arith.addf %155, %154 : vector<4x96xf32>
    %157 = arith.divf %155, %156 : vector<4x96xf32>
    %158 = vector.extract_strided_slice %157 {offsets = [0, 0], sizes = [4, 32], strides = [1, 1]} : vector<4x96xf32> to vector<4x32xf32>
    %159 = vector.extract_strided_slice %157 {offsets = [0, 32], sizes = [4, 32], strides = [1, 1]} : vector<4x96xf32> to vector<4x32xf32>
    %160 = vector.extract_strided_slice %157 {offsets = [0, 64], sizes = [4, 32], strides = [1, 1]} : vector<4x96xf32> to vector<4x32xf32>
    %161 = vector.extract_strided_slice %151 {offsets = [0, 96], sizes = [4, 32], strides = [1, 1]} : vector<4x128xf32> to vector<4x32xf32>
    %162 = math.tanh %161 : vector<4x32xf32>
    %c0_90 = arith.constant 0 : index
    %c0_91 = arith.constant 0 : index
    %163 = vector.load %arg9[%c0_90, %c0_91] : memref<4x32xf32, #tpu.memory_space<vmem>>, vector<4x32xf32>
    %164 = arith.mulf %159, %163 : vector<4x32xf32>
    %165 = arith.mulf %158, %162 : vector<4x32xf32>
    %166 = arith.addf %164, %165 : vector<4x32xf32>
    %167 = math.tanh %166 : vector<4x32xf32>
    %168 = arith.mulf %160, %167 : vector<4x32xf32>
    %c0_92 = arith.constant 0 : index
    %c0_93 = arith.constant 0 : index
    %169 = vector.load %arg9[%c0_92, %c0_93] : memref<4x32xf32, #tpu.memory_space<vmem>>, vector<4x32xf32>
    tpu.vector_store %arg9[%c0_92, %c0_93], %166 {strides = array<i32>} : memref<4x32xf32, #tpu.memory_space<vmem>>, vector<4x32xf32>,
    %c0_94 = arith.constant 0 : index
    %c0_95 = arith.constant 0 : index
    %170 = vector.load %arg8[%c0_94, %c0_95] : memref<4x32xf32, #tpu.memory_space<vmem>>, vector<4x32xf32>
    tpu.vector_store %arg8[%c0_94, %c0_95], %168 {strides = array<i32>} : memref<4x32xf32, #tpu.memory_space<vmem>>, vector<4x32xf32>,
    %171 = arith.truncf %168 : vector<4x32xf32> to vector<4x32xbf16>
    %c0_96 = arith.constant 0 : index
    %172 = arith.index_cast %144 : i32 to index
    %c0_97 = arith.constant 0 : index
    %c0_98 = arith.constant 0 : index
    %173 = vector.load %arg6[%c0_96, %172, %c0_97, %c0_98] : memref<1x4x4x32xbf16, #tpu.memory_space<vmem>>, vector<1x1x4x32xbf16>
    %174 = vector.shape_cast %173 : vector<1x1x4x32xbf16> to vector<4x32xbf16>
    %175 = vector.shape_cast %171 : vector<4x32xbf16> to vector<1x1x4x32xbf16>
    tpu.vector_store %arg6[%c0_96, %172, %c0_97, %c0_98], %175 {strides = array<i32>} : memref<1x4x4x32xbf16, #tpu.memory_space<vmem>>, vector<1x1x4x32xbf16>,
    %c4_i32 = arith.constant 4 : i32
    return
  }
  func.func @transform_0(%arg0: i32, %arg1: i32) -> (i32, i32, i32) {
    %c2_i32 = arith.constant 2 : i32
    %0 = arith.muli %c2_i32, %arg1 : i32
    %c1_i32 = arith.constant 1 : i32
    %1 = arith.subi %c1_i32, %0 : i32
    %2 = arith.muli %arg0, %1 : i32
    %3 = arith.addi %arg1, %2 : i32
    %c0_i32 = arith.constant 0 : i32
    %c0_i32_0 = arith.constant 0 : i32
    %c0_i32_1 = arith.constant 0 : i32
    return %c0_i32, %3, %c0_i32_0 : i32, i32, i32
  }
  func.func @transform_1(%arg0: i32, %arg1: i32) -> (i32, i32, i32, i32) {
    %c0_i32 = arith.constant 0 : i32
    %c0_i32_0 = arith.constant 0 : i32
    %c0_i32_1 = arith.constant 0 : i32
    %c0_i32_2 = arith.constant 0 : i32
    return %arg0, %c0_i32, %c0_i32_0, %c0_i32_1 : i32, i32, i32, i32
  }
  func.func @transform_2(%arg0: i32, %arg1: i32) -> (i32, i32, i32) {
    %c0_i32 = arith.constant 0 : i32
    %c0_i32_0 = arith.constant 0 : i32
    %c0_i32_1 = arith.constant 0 : i32
    return %arg0, %c0_i32, %c0_i32_0 : i32, i32, i32
  }
  func.func @transform_3(%arg0: i32, %arg1: i32) -> (i32, i32, i32) {
    %c0_i32 = arith.constant 0 : i32
    %c0_i32_0 = arith.constant 0 : i32
    %c0_i32_1 = arith.constant 0 : i32
    return %arg0, %c0_i32, %c0_i32_0 : i32, i32, i32
  }
  func.func @transform_4(%arg0: i32, %arg1: i32) -> (i32, i32, i32, i32) {
    %c2_i32 = arith.constant 2 : i32
    %0 = arith.muli %c2_i32, %arg1 : i32
    %c1_i32 = arith.constant 1 : i32
    %1 = arith.subi %c1_i32, %0 : i32
    %2 = arith.muli %arg0, %1 : i32
    %3 = arith.addi %arg1, %2 : i32
    %c0_i32 = arith.constant 0 : i32
    %c0_i32_0 = arith.constant 0 : i32
    %c0_i32_1 = arith.constant 0 : i32
    return %arg0, %3, %c0_i32, %c0_i32_0 : i32, i32, i32, i32
  }
}

module attributes {stable_mosaic.version = 11 : i64} {
  func.func @_bilstm_chunk_kernel(%arg0: i32, %arg1: i32, %arg2: memref<1x16x32xbf16, #tpu.memory_space<vmem>>, %arg3: memref<1x1x32x128xbf16, #tpu.memory_space<vmem>>, %arg4: memref<1x32x128xbf16, #tpu.memory_space<vmem>>, %arg5: memref<1x1x128xf32, #tpu.memory_space<vmem>>, %arg6: memref<1x4x4x32xbf16, #tpu.memory_space<vmem>>, %arg7: memref<4x4x128xf32, #tpu.memory_space<vmem>>, %arg8: memref<4x32xf32, #tpu.memory_space<vmem>>, %arg9: memref<4x32xf32, #tpu.memory_space<vmem>>) attributes {dimension_semantics = [#tpu.dimension_semantics<parallel>, #tpu.dimension_semantics<arbitrary>], iteration_bounds = array<i64: 2, 2>, scalar_prefetch = 0 : i64, scratch_operands = 3 : i64, tpu.core_type = #tpu.core_type<tc>, window_params = [{transform_indices = @transform_0, window_bounds = array<i64: 1, 16, 32>}, {transform_indices = @transform_1, window_bounds = array<i64: 1, 1, 32, 128>}, {transform_indices = @transform_2, window_bounds = array<i64: 1, 32, 128>}, {transform_indices = @transform_3, window_bounds = array<i64: 1, 1, 128>}, {transform_indices = @transform_4, window_bounds = array<i64: 1, 4, 4, 32>}]} {
    %c0_i32 = arith.constant 0 : i32
    %0 = arith.cmpi eq, %arg1, %c0_i32 : i32
    %1 = arith.extui %0 : i1 to i32
    %c0_i32_0 = arith.constant 0 : i32
    %2 = arith.cmpi ne, %1, %c0_i32_0 : i32
    scf.if %2 {
      %cst_91 = arith.constant 0.000000e+00 : f32
      %170 = vector.broadcast %cst_91 : f32 to vector<4x32xf32>
      %c0_92 = arith.constant 0 : index
      %c0_93 = arith.constant 0 : index
      %171 = vector.load %arg8[%c0_92, %c0_93] : memref<4x32xf32, #tpu.memory_space<vmem>>, vector<4x32xf32>
      tpu.vector_store %arg8[%c0_92, %c0_93], %170 {strides = array<i32>} : memref<4x32xf32, #tpu.memory_space<vmem>>, vector<4x32xf32>,
      %cst_94 = arith.constant 0.000000e+00 : f32
      %172 = vector.broadcast %cst_94 : f32 to vector<4x32xf32>
      %c0_95 = arith.constant 0 : index
      %c0_96 = arith.constant 0 : index
      %173 = vector.load %arg9[%c0_95, %c0_96] : memref<4x32xf32, #tpu.memory_space<vmem>>, vector<4x32xf32>
      tpu.vector_store %arg9[%c0_95, %c0_96], %172 {strides = array<i32>} : memref<4x32xf32, #tpu.memory_space<vmem>>, vector<4x32xf32>,
    } else {
    }
    %c0 = arith.constant 0 : index
    %c0_1 = arith.constant 0 : index
    %c0_2 = arith.constant 0 : index
    %3 = vector.load %arg2[%c0, %c0_1, %c0_2] : memref<1x16x32xbf16, #tpu.memory_space<vmem>>, vector<1x16x32xbf16>
    %4 = vector.shape_cast %3 : vector<1x16x32xbf16> to vector<16x32xbf16>
    %c0_3 = arith.constant 0 : index
    %c0_4 = arith.constant 0 : index
    %c0_5 = arith.constant 0 : index
    %c0_6 = arith.constant 0 : index
    %5 = vector.load %arg3[%c0_3, %c0_4, %c0_5, %c0_6] : memref<1x1x32x128xbf16, #tpu.memory_space<vmem>>, vector<1x1x32x128xbf16>
    %6 = vector.shape_cast %5 : vector<1x1x32x128xbf16> to vector<32x128xbf16>
    %cst = arith.constant dense<0.000000e+00> : vector<16x128xf32>
    %7 = tpu.matmul %4, %6, %cst {dimension_numbers = #tpu.dot_dimension_numbers<[1], [0], [0], [1], [0, 0, 1, 1], [], []>} : vector<16x32xbf16>, vector<32x128xbf16>, vector<16x128xf32> -> vector<16x128xf32>
    %c0_7 = arith.constant 0 : index
    %c0_8 = arith.constant 0 : index
    %c0_9 = arith.constant 0 : index
    %8 = vector.load %arg5[%c0_7, %c0_8, %c0_9] : memref<1x1x128xf32, #tpu.memory_space<vmem>>, vector<1x1x128xf32>
    %9 = vector.shape_cast %8 : vector<1x1x128xf32> to vector<1x128xf32>
    %10 = vector.broadcast %9 : vector<1x128xf32> to vector<16x128xf32>
    %11 = arith.addf %7, %10 : vector<16x128xf32>
    %12 = vector.extract_strided_slice %11 {offsets = [0, 0], sizes = [4, 128], strides = [1, 1]} : vector<16x128xf32> to vector<4x128xf32>
    %c0_10 = arith.constant 0 : index
    %c0_11 = arith.constant 0 : index
    %c0_12 = arith.constant 0 : index
    %13 = vector.load %arg7[%c0_10, %c0_11, %c0_12] : memref<4x4x128xf32, #tpu.memory_space<vmem>>, vector<1x4x128xf32>
    %14 = vector.shape_cast %13 : vector<1x4x128xf32> to vector<4x128xf32>
    %15 = vector.shape_cast %12 : vector<4x128xf32> to vector<1x4x128xf32>
    tpu.vector_store %arg7[%c0_10, %c0_11, %c0_12], %15 {strides = array<i32>} : memref<4x4x128xf32, #tpu.memory_space<vmem>>, vector<1x4x128xf32>,
    %16 = vector.extract_strided_slice %11 {offsets = [4, 0], sizes = [4, 128], strides = [1, 1]} : vector<16x128xf32> to vector<4x128xf32>
    %c1 = arith.constant 1 : index
    %c0_13 = arith.constant 0 : index
    %c0_14 = arith.constant 0 : index
    %17 = vector.load %arg7[%c1, %c0_13, %c0_14] : memref<4x4x128xf32, #tpu.memory_space<vmem>>, vector<1x4x128xf32>
    %18 = vector.shape_cast %17 : vector<1x4x128xf32> to vector<4x128xf32>
    %19 = vector.shape_cast %16 : vector<4x128xf32> to vector<1x4x128xf32>
    tpu.vector_store %arg7[%c1, %c0_13, %c0_14], %19 {strides = array<i32>} : memref<4x4x128xf32, #tpu.memory_space<vmem>>, vector<1x4x128xf32>,
    %20 = vector.extract_strided_slice %11 {offsets = [8, 0], sizes = [4, 128], strides = [1, 1]} : vector<16x128xf32> to vector<4x128xf32>
    %c2 = arith.constant 2 : index
    %c0_15 = arith.constant 0 : index
    %c0_16 = arith.constant 0 : index
    %21 = vector.load %arg7[%c2, %c0_15, %c0_16] : memref<4x4x128xf32, #tpu.memory_space<vmem>>, vector<1x4x128xf32>
    %22 = vector.shape_cast %21 : vector<1x4x128xf32> to vector<4x128xf32>
    %23 = vector.shape_cast %20 : vector<4x128xf32> to vector<1x4x128xf32>
    tpu.vector_store %arg7[%c2, %c0_15, %c0_16], %23 {strides = array<i32>} : memref<4x4x128xf32, #tpu.memory_space<vmem>>, vector<1x4x128xf32>,
    %24 = vector.extract_strided_slice %11 {offsets = [12, 0], sizes = [4, 128], strides = [1, 1]} : vector<16x128xf32> to vector<4x128xf32>
    %c3 = arith.constant 3 : index
    %c0_17 = arith.constant 0 : index
    %c0_18 = arith.constant 0 : index
    %25 = vector.load %arg7[%c3, %c0_17, %c0_18] : memref<4x4x128xf32, #tpu.memory_space<vmem>>, vector<1x4x128xf32>
    %26 = vector.shape_cast %25 : vector<1x4x128xf32> to vector<4x128xf32>
    %27 = vector.shape_cast %24 : vector<4x128xf32> to vector<1x4x128xf32>
    tpu.vector_store %arg7[%c3, %c0_17, %c0_18], %27 {strides = array<i32>} : memref<4x4x128xf32, #tpu.memory_space<vmem>>, vector<1x4x128xf32>,
    %c0_19 = arith.constant 0 : index
    %c0_20 = arith.constant 0 : index
    %c0_21 = arith.constant 0 : index
    %28 = vector.load %arg4[%c0_19, %c0_20, %c0_21] : memref<1x32x128xbf16, #tpu.memory_space<vmem>>, vector<1x32x128xbf16>
    %29 = vector.shape_cast %28 : vector<1x32x128xbf16> to vector<32x128xbf16>
    %c0_i32_22 = arith.constant 0 : i32
    %c2_i32 = arith.constant 2 : i32
    %30 = arith.muli %c2_i32, %c0_i32_22 : i32
    %c3_i32 = arith.constant 3 : i32
    %31 = arith.subi %c3_i32, %30 : i32
    %32 = arith.muli %arg0, %31 : i32
    %33 = arith.addi %c0_i32_22, %32 : i32
    %34 = arith.index_cast %33 : i32 to index
    %c0_23 = arith.constant 0 : index
    %c0_24 = arith.constant 0 : index
    %35 = vector.load %arg7[%34, %c0_23, %c0_24] : memref<4x4x128xf32, #tpu.memory_space<vmem>>, vector<1x4x128xf32>
    %36 = vector.shape_cast %35 : vector<1x4x128xf32> to vector<4x128xf32>
    %c0_25 = arith.constant 0 : index
    %c0_26 = arith.constant 0 : index
    %37 = vector.load %arg8[%c0_25, %c0_26] : memref<4x32xf32, #tpu.memory_space<vmem>>, vector<4x32xf32>
    %38 = arith.truncf %37 : vector<4x32xf32> to vector<4x32xbf16>
    %cst_27 = arith.constant dense<0.000000e+00> : vector<4x128xf32>
    %39 = tpu.matmul %38, %29, %cst_27 {dimension_numbers = #tpu.dot_dimension_numbers<[1], [0], [0], [1], [0, 0, 1, 1], [], []>} : vector<4x32xbf16>, vector<32x128xbf16>, vector<4x128xf32> -> vector<4x128xf32>
    %40 = arith.addf %36, %39 : vector<4x128xf32>
    %41 = vector.extract_strided_slice %40 {offsets = [0, 0], sizes = [4, 96], strides = [1, 1]} : vector<4x128xf32> to vector<4x96xf32>
    %42 = arith.negf %41 : vector<4x96xf32>
    %43 = math.exp %42 : vector<4x96xf32>
    %cst_28 = arith.constant 1.000000e+00 : f32
    %44 = vector.broadcast %cst_28 : f32 to vector<4x96xf32>
    %45 = arith.addf %44, %43 : vector<4x96xf32>
    %46 = arith.divf %44, %45 : vector<4x96xf32>
    %47 = vector.extract_strided_slice %46 {offsets = [0, 0], sizes = [4, 32], strides = [1, 1]} : vector<4x96xf32> to vector<4x32xf32>
    %48 = vector.extract_strided_slice %46 {offsets = [0, 32], sizes = [4, 32], strides = [1, 1]} : vector<4x96xf32> to vector<4x32xf32>
    %49 = vector.extract_strided_slice %46 {offsets = [0, 64], sizes = [4, 32], strides = [1, 1]} : vector<4x96xf32> to vector<4x32xf32>
    %50 = vector.extract_strided_slice %40 {offsets = [0, 96], sizes = [4, 32], strides = [1, 1]} : vector<4x128xf32> to vector<4x32xf32>
    %51 = math.tanh %50 : vector<4x32xf32>
    %c0_29 = arith.constant 0 : index
    %c0_30 = arith.constant 0 : index
    %52 = vector.load %arg9[%c0_29, %c0_30] : memref<4x32xf32, #tpu.memory_space<vmem>>, vector<4x32xf32>
    %53 = arith.mulf %48, %52 : vector<4x32xf32>
    %54 = arith.mulf %47, %51 : vector<4x32xf32>
    %55 = arith.addf %53, %54 : vector<4x32xf32>
    %56 = math.tanh %55 : vector<4x32xf32>
    %57 = arith.mulf %49, %56 : vector<4x32xf32>
    %c0_31 = arith.constant 0 : index
    %c0_32 = arith.constant 0 : index
    %58 = vector.load %arg9[%c0_31, %c0_32] : memref<4x32xf32, #tpu.memory_space<vmem>>, vector<4x32xf32>
    tpu.vector_store %arg9[%c0_31, %c0_32], %55 {strides = array<i32>} : memref<4x32xf32, #tpu.memory_space<vmem>>, vector<4x32xf32>,
    %c0_33 = arith.constant 0 : index
    %c0_34 = arith.constant 0 : index
    %59 = vector.load %arg8[%c0_33, %c0_34] : memref<4x32xf32, #tpu.memory_space<vmem>>, vector<4x32xf32>
    tpu.vector_store %arg8[%c0_33, %c0_34], %57 {strides = array<i32>} : memref<4x32xf32, #tpu.memory_space<vmem>>, vector<4x32xf32>,
    %60 = arith.truncf %57 : vector<4x32xf32> to vector<4x32xbf16>
    %c0_35 = arith.constant 0 : index
    %61 = arith.index_cast %33 : i32 to index
    %c0_36 = arith.constant 0 : index
    %c0_37 = arith.constant 0 : index
    %62 = vector.load %arg6[%c0_35, %61, %c0_36, %c0_37] : memref<1x4x4x32xbf16, #tpu.memory_space<vmem>>, vector<1x1x4x32xbf16>
    %63 = vector.shape_cast %62 : vector<1x1x4x32xbf16> to vector<4x32xbf16>
    %64 = vector.shape_cast %60 : vector<4x32xbf16> to vector<1x1x4x32xbf16>
    tpu.vector_store %arg6[%c0_35, %61, %c0_36, %c0_37], %64 {strides = array<i32>} : memref<1x4x4x32xbf16, #tpu.memory_space<vmem>>, vector<1x1x4x32xbf16>,
    %c1_i32 = arith.constant 1 : i32
    %c2_i32_38 = arith.constant 2 : i32
    %65 = arith.muli %c2_i32_38, %c1_i32 : i32
    %c3_i32_39 = arith.constant 3 : i32
    %66 = arith.subi %c3_i32_39, %65 : i32
    %67 = arith.muli %arg0, %66 : i32
    %68 = arith.addi %c1_i32, %67 : i32
    %69 = arith.index_cast %68 : i32 to index
    %c0_40 = arith.constant 0 : index
    %c0_41 = arith.constant 0 : index
    %70 = vector.load %arg7[%69, %c0_40, %c0_41] : memref<4x4x128xf32, #tpu.memory_space<vmem>>, vector<1x4x128xf32>
    %71 = vector.shape_cast %70 : vector<1x4x128xf32> to vector<4x128xf32>
    %c0_42 = arith.constant 0 : index
    %c0_43 = arith.constant 0 : index
    %72 = vector.load %arg8[%c0_42, %c0_43] : memref<4x32xf32, #tpu.memory_space<vmem>>, vector<4x32xf32>
    %73 = arith.truncf %72 : vector<4x32xf32> to vector<4x32xbf16>
    %cst_44 = arith.constant dense<0.000000e+00> : vector<4x128xf32>
    %74 = tpu.matmul %73, %29, %cst_44 {dimension_numbers = #tpu.dot_dimension_numbers<[1], [0], [0], [1], [0, 0, 1, 1], [], []>} : vector<4x32xbf16>, vector<32x128xbf16>, vector<4x128xf32> -> vector<4x128xf32>
    %75 = arith.addf %71, %74 : vector<4x128xf32>
    %76 = vector.extract_strided_slice %75 {offsets = [0, 0], sizes = [4, 96], strides = [1, 1]} : vector<4x128xf32> to vector<4x96xf32>
    %77 = arith.negf %76 : vector<4x96xf32>
    %78 = math.exp %77 : vector<4x96xf32>
    %cst_45 = arith.constant 1.000000e+00 : f32
    %79 = vector.broadcast %cst_45 : f32 to vector<4x96xf32>
    %80 = arith.addf %79, %78 : vector<4x96xf32>
    %81 = arith.divf %79, %80 : vector<4x96xf32>
    %82 = vector.extract_strided_slice %81 {offsets = [0, 0], sizes = [4, 32], strides = [1, 1]} : vector<4x96xf32> to vector<4x32xf32>
    %83 = vector.extract_strided_slice %81 {offsets = [0, 32], sizes = [4, 32], strides = [1, 1]} : vector<4x96xf32> to vector<4x32xf32>
    %84 = vector.extract_strided_slice %81 {offsets = [0, 64], sizes = [4, 32], strides = [1, 1]} : vector<4x96xf32> to vector<4x32xf32>
    %85 = vector.extract_strided_slice %75 {offsets = [0, 96], sizes = [4, 32], strides = [1, 1]} : vector<4x128xf32> to vector<4x32xf32>
    %86 = math.tanh %85 : vector<4x32xf32>
    %c0_46 = arith.constant 0 : index
    %c0_47 = arith.constant 0 : index
    %87 = vector.load %arg9[%c0_46, %c0_47] : memref<4x32xf32, #tpu.memory_space<vmem>>, vector<4x32xf32>
    %88 = arith.mulf %83, %87 : vector<4x32xf32>
    %89 = arith.mulf %82, %86 : vector<4x32xf32>
    %90 = arith.addf %88, %89 : vector<4x32xf32>
    %91 = math.tanh %90 : vector<4x32xf32>
    %92 = arith.mulf %84, %91 : vector<4x32xf32>
    %c0_48 = arith.constant 0 : index
    %c0_49 = arith.constant 0 : index
    %93 = vector.load %arg9[%c0_48, %c0_49] : memref<4x32xf32, #tpu.memory_space<vmem>>, vector<4x32xf32>
    tpu.vector_store %arg9[%c0_48, %c0_49], %90 {strides = array<i32>} : memref<4x32xf32, #tpu.memory_space<vmem>>, vector<4x32xf32>,
    %c0_50 = arith.constant 0 : index
    %c0_51 = arith.constant 0 : index
    %94 = vector.load %arg8[%c0_50, %c0_51] : memref<4x32xf32, #tpu.memory_space<vmem>>, vector<4x32xf32>
    tpu.vector_store %arg8[%c0_50, %c0_51], %92 {strides = array<i32>} : memref<4x32xf32, #tpu.memory_space<vmem>>, vector<4x32xf32>,
    %95 = arith.truncf %92 : vector<4x32xf32> to vector<4x32xbf16>
    %c0_52 = arith.constant 0 : index
    %96 = arith.index_cast %68 : i32 to index
    %c0_53 = arith.constant 0 : index
    %c0_54 = arith.constant 0 : index
    %97 = vector.load %arg6[%c0_52, %96, %c0_53, %c0_54] : memref<1x4x4x32xbf16, #tpu.memory_space<vmem>>, vector<1x1x4x32xbf16>
    %98 = vector.shape_cast %97 : vector<1x1x4x32xbf16> to vector<4x32xbf16>
    %99 = vector.shape_cast %95 : vector<4x32xbf16> to vector<1x1x4x32xbf16>
    tpu.vector_store %arg6[%c0_52, %96, %c0_53, %c0_54], %99 {strides = array<i32>} : memref<1x4x4x32xbf16, #tpu.memory_space<vmem>>, vector<1x1x4x32xbf16>,
    %c2_i32_55 = arith.constant 2 : i32
    %c2_i32_56 = arith.constant 2 : i32
    %100 = arith.muli %c2_i32_56, %c2_i32_55 : i32
    %c3_i32_57 = arith.constant 3 : i32
    %101 = arith.subi %c3_i32_57, %100 : i32
    %102 = arith.muli %arg0, %101 : i32
    %103 = arith.addi %c2_i32_55, %102 : i32
    %104 = arith.index_cast %103 : i32 to index
    %c0_58 = arith.constant 0 : index
    %c0_59 = arith.constant 0 : index
    %105 = vector.load %arg7[%104, %c0_58, %c0_59] : memref<4x4x128xf32, #tpu.memory_space<vmem>>, vector<1x4x128xf32>
    %106 = vector.shape_cast %105 : vector<1x4x128xf32> to vector<4x128xf32>
    %c0_60 = arith.constant 0 : index
    %c0_61 = arith.constant 0 : index
    %107 = vector.load %arg8[%c0_60, %c0_61] : memref<4x32xf32, #tpu.memory_space<vmem>>, vector<4x32xf32>
    %108 = arith.truncf %107 : vector<4x32xf32> to vector<4x32xbf16>
    %cst_62 = arith.constant dense<0.000000e+00> : vector<4x128xf32>
    %109 = tpu.matmul %108, %29, %cst_62 {dimension_numbers = #tpu.dot_dimension_numbers<[1], [0], [0], [1], [0, 0, 1, 1], [], []>} : vector<4x32xbf16>, vector<32x128xbf16>, vector<4x128xf32> -> vector<4x128xf32>
    %110 = arith.addf %106, %109 : vector<4x128xf32>
    %111 = vector.extract_strided_slice %110 {offsets = [0, 0], sizes = [4, 96], strides = [1, 1]} : vector<4x128xf32> to vector<4x96xf32>
    %112 = arith.negf %111 : vector<4x96xf32>
    %113 = math.exp %112 : vector<4x96xf32>
    %cst_63 = arith.constant 1.000000e+00 : f32
    %114 = vector.broadcast %cst_63 : f32 to vector<4x96xf32>
    %115 = arith.addf %114, %113 : vector<4x96xf32>
    %116 = arith.divf %114, %115 : vector<4x96xf32>
    %117 = vector.extract_strided_slice %116 {offsets = [0, 0], sizes = [4, 32], strides = [1, 1]} : vector<4x96xf32> to vector<4x32xf32>
    %118 = vector.extract_strided_slice %116 {offsets = [0, 32], sizes = [4, 32], strides = [1, 1]} : vector<4x96xf32> to vector<4x32xf32>
    %119 = vector.extract_strided_slice %116 {offsets = [0, 64], sizes = [4, 32], strides = [1, 1]} : vector<4x96xf32> to vector<4x32xf32>
    %120 = vector.extract_strided_slice %110 {offsets = [0, 96], sizes = [4, 32], strides = [1, 1]} : vector<4x128xf32> to vector<4x32xf32>
    %121 = math.tanh %120 : vector<4x32xf32>
    %c0_64 = arith.constant 0 : index
    %c0_65 = arith.constant 0 : index
    %122 = vector.load %arg9[%c0_64, %c0_65] : memref<4x32xf32, #tpu.memory_space<vmem>>, vector<4x32xf32>
    %123 = arith.mulf %118, %122 : vector<4x32xf32>
    %124 = arith.mulf %117, %121 : vector<4x32xf32>
    %125 = arith.addf %123, %124 : vector<4x32xf32>
    %126 = math.tanh %125 : vector<4x32xf32>
    %127 = arith.mulf %119, %126 : vector<4x32xf32>
    %c0_66 = arith.constant 0 : index
    %c0_67 = arith.constant 0 : index
    %128 = vector.load %arg9[%c0_66, %c0_67] : memref<4x32xf32, #tpu.memory_space<vmem>>, vector<4x32xf32>
    tpu.vector_store %arg9[%c0_66, %c0_67], %125 {strides = array<i32>} : memref<4x32xf32, #tpu.memory_space<vmem>>, vector<4x32xf32>,
    %c0_68 = arith.constant 0 : index
    %c0_69 = arith.constant 0 : index
    %129 = vector.load %arg8[%c0_68, %c0_69] : memref<4x32xf32, #tpu.memory_space<vmem>>, vector<4x32xf32>
    tpu.vector_store %arg8[%c0_68, %c0_69], %127 {strides = array<i32>} : memref<4x32xf32, #tpu.memory_space<vmem>>, vector<4x32xf32>,
    %130 = arith.truncf %127 : vector<4x32xf32> to vector<4x32xbf16>
    %c0_70 = arith.constant 0 : index
    %131 = arith.index_cast %103 : i32 to index
    %c0_71 = arith.constant 0 : index
    %c0_72 = arith.constant 0 : index
    %132 = vector.load %arg6[%c0_70, %131, %c0_71, %c0_72] : memref<1x4x4x32xbf16, #tpu.memory_space<vmem>>, vector<1x1x4x32xbf16>
    %133 = vector.shape_cast %132 : vector<1x1x4x32xbf16> to vector<4x32xbf16>
    %134 = vector.shape_cast %130 : vector<4x32xbf16> to vector<1x1x4x32xbf16>
    tpu.vector_store %arg6[%c0_70, %131, %c0_71, %c0_72], %134 {strides = array<i32>} : memref<1x4x4x32xbf16, #tpu.memory_space<vmem>>, vector<1x1x4x32xbf16>,
    %c3_i32_73 = arith.constant 3 : i32
    %c2_i32_74 = arith.constant 2 : i32
    %135 = arith.muli %c2_i32_74, %c3_i32_73 : i32
    %c3_i32_75 = arith.constant 3 : i32
    %136 = arith.subi %c3_i32_75, %135 : i32
    %137 = arith.muli %arg0, %136 : i32
    %138 = arith.addi %c3_i32_73, %137 : i32
    %139 = arith.index_cast %138 : i32 to index
    %c0_76 = arith.constant 0 : index
    %c0_77 = arith.constant 0 : index
    %140 = vector.load %arg7[%139, %c0_76, %c0_77] : memref<4x4x128xf32, #tpu.memory_space<vmem>>, vector<1x4x128xf32>
    %141 = vector.shape_cast %140 : vector<1x4x128xf32> to vector<4x128xf32>
    %c0_78 = arith.constant 0 : index
    %c0_79 = arith.constant 0 : index
    %142 = vector.load %arg8[%c0_78, %c0_79] : memref<4x32xf32, #tpu.memory_space<vmem>>, vector<4x32xf32>
    %143 = arith.truncf %142 : vector<4x32xf32> to vector<4x32xbf16>
    %cst_80 = arith.constant dense<0.000000e+00> : vector<4x128xf32>
    %144 = tpu.matmul %143, %29, %cst_80 {dimension_numbers = #tpu.dot_dimension_numbers<[1], [0], [0], [1], [0, 0, 1, 1], [], []>} : vector<4x32xbf16>, vector<32x128xbf16>, vector<4x128xf32> -> vector<4x128xf32>
    %145 = arith.addf %141, %144 : vector<4x128xf32>
    %146 = vector.extract_strided_slice %145 {offsets = [0, 0], sizes = [4, 96], strides = [1, 1]} : vector<4x128xf32> to vector<4x96xf32>
    %147 = arith.negf %146 : vector<4x96xf32>
    %148 = math.exp %147 : vector<4x96xf32>
    %cst_81 = arith.constant 1.000000e+00 : f32
    %149 = vector.broadcast %cst_81 : f32 to vector<4x96xf32>
    %150 = arith.addf %149, %148 : vector<4x96xf32>
    %151 = arith.divf %149, %150 : vector<4x96xf32>
    %152 = vector.extract_strided_slice %151 {offsets = [0, 0], sizes = [4, 32], strides = [1, 1]} : vector<4x96xf32> to vector<4x32xf32>
    %153 = vector.extract_strided_slice %151 {offsets = [0, 32], sizes = [4, 32], strides = [1, 1]} : vector<4x96xf32> to vector<4x32xf32>
    %154 = vector.extract_strided_slice %151 {offsets = [0, 64], sizes = [4, 32], strides = [1, 1]} : vector<4x96xf32> to vector<4x32xf32>
    %155 = vector.extract_strided_slice %145 {offsets = [0, 96], sizes = [4, 32], strides = [1, 1]} : vector<4x128xf32> to vector<4x32xf32>
    %156 = math.tanh %155 : vector<4x32xf32>
    %c0_82 = arith.constant 0 : index
    %c0_83 = arith.constant 0 : index
    %157 = vector.load %arg9[%c0_82, %c0_83] : memref<4x32xf32, #tpu.memory_space<vmem>>, vector<4x32xf32>
    %158 = arith.mulf %153, %157 : vector<4x32xf32>
    %159 = arith.mulf %152, %156 : vector<4x32xf32>
    %160 = arith.addf %158, %159 : vector<4x32xf32>
    %161 = math.tanh %160 : vector<4x32xf32>
    %162 = arith.mulf %154, %161 : vector<4x32xf32>
    %c0_84 = arith.constant 0 : index
    %c0_85 = arith.constant 0 : index
    %163 = vector.load %arg9[%c0_84, %c0_85] : memref<4x32xf32, #tpu.memory_space<vmem>>, vector<4x32xf32>
    tpu.vector_store %arg9[%c0_84, %c0_85], %160 {strides = array<i32>} : memref<4x32xf32, #tpu.memory_space<vmem>>, vector<4x32xf32>,
    %c0_86 = arith.constant 0 : index
    %c0_87 = arith.constant 0 : index
    %164 = vector.load %arg8[%c0_86, %c0_87] : memref<4x32xf32, #tpu.memory_space<vmem>>, vector<4x32xf32>
    tpu.vector_store %arg8[%c0_86, %c0_87], %162 {strides = array<i32>} : memref<4x32xf32, #tpu.memory_space<vmem>>, vector<4x32xf32>,
    %165 = arith.truncf %162 : vector<4x32xf32> to vector<4x32xbf16>
    %c0_88 = arith.constant 0 : index
    %166 = arith.index_cast %138 : i32 to index
    %c0_89 = arith.constant 0 : index
    %c0_90 = arith.constant 0 : index
    %167 = vector.load %arg6[%c0_88, %166, %c0_89, %c0_90] : memref<1x4x4x32xbf16, #tpu.memory_space<vmem>>, vector<1x1x4x32xbf16>
    %168 = vector.shape_cast %167 : vector<1x1x4x32xbf16> to vector<4x32xbf16>
    %169 = vector.shape_cast %165 : vector<4x32xbf16> to vector<1x1x4x32xbf16>
    tpu.vector_store %arg6[%c0_88, %166, %c0_89, %c0_90], %169 {strides = array<i32>} : memref<1x4x4x32xbf16, #tpu.memory_space<vmem>>, vector<1x1x4x32xbf16>,
    %c4_i32 = arith.constant 4 : i32
    return
  }
  func.func @transform_0(%arg0: i32, %arg1: i32) -> (i32, i32, i32) {
    %c2_i32 = arith.constant 2 : i32
    %0 = arith.muli %c2_i32, %arg1 : i32
    %c1_i32 = arith.constant 1 : i32
    %1 = arith.subi %c1_i32, %0 : i32
    %2 = arith.muli %arg0, %1 : i32
    %3 = arith.addi %arg1, %2 : i32
    %c0_i32 = arith.constant 0 : i32
    %c0_i32_0 = arith.constant 0 : i32
    %c0_i32_1 = arith.constant 0 : i32
    return %c0_i32, %3, %c0_i32_0 : i32, i32, i32
  }
  func.func @transform_1(%arg0: i32, %arg1: i32) -> (i32, i32, i32, i32) {
    %c0_i32 = arith.constant 0 : i32
    %c0_i32_0 = arith.constant 0 : i32
    %c0_i32_1 = arith.constant 0 : i32
    %c0_i32_2 = arith.constant 0 : i32
    return %arg0, %c0_i32, %c0_i32_0, %c0_i32_1 : i32, i32, i32, i32
  }
  func.func @transform_2(%arg0: i32, %arg1: i32) -> (i32, i32, i32) {
    %c0_i32 = arith.constant 0 : i32
    %c0_i32_0 = arith.constant 0 : i32
    %c0_i32_1 = arith.constant 0 : i32
    return %arg0, %c0_i32, %c0_i32_0 : i32, i32, i32
  }
  func.func @transform_3(%arg0: i32, %arg1: i32) -> (i32, i32, i32) {
    %c0_i32 = arith.constant 0 : i32
    %c0_i32_0 = arith.constant 0 : i32
    %c0_i32_1 = arith.constant 0 : i32
    return %arg0, %c0_i32, %c0_i32_0 : i32, i32, i32
  }
  func.func @transform_4(%arg0: i32, %arg1: i32) -> (i32, i32, i32, i32) {
    %c2_i32 = arith.constant 2 : i32
    %0 = arith.muli %c2_i32, %arg1 : i32
    %c1_i32 = arith.constant 1 : i32
    %1 = arith.subi %c1_i32, %0 : i32
    %2 = arith.muli %arg0, %1 : i32
    %3 = arith.addi %arg1, %2 : i32
    %c0_i32 = arith.constant 0 : i32
    %c0_i32_0 = arith.constant 0 : i32
    %c0_i32_1 = arith.constant 0 : i32
    return %arg0, %3, %c0_i32, %c0_i32_0 : i32, i32, i32, i32
  }
}

module attributes {stable_mosaic.version = 11 : i64} {
  func.func @_linear_kernel(%arg0: i32, %arg1: i32, %arg2: memref<4x64xbf16, #tpu.memory_space<vmem>>, %arg3: memref<64x64xbf16, #tpu.memory_space<vmem>>, %arg4: memref<1x64xf32, #tpu.memory_space<vmem>>, %arg5: memref<4x64xf32, #tpu.memory_space<vmem>>) attributes {dimension_semantics = [#tpu.dimension_semantics<parallel>, #tpu.dimension_semantics<parallel>], iteration_bounds = array<i64: 1, 1>, scalar_prefetch = 0 : i64, scratch_operands = 0 : i64, tpu.core_type = #tpu.core_type<tc>, window_params = [{transform_indices = @transform_0, window_bounds = array<i64: 4, 64>}, {transform_indices = @transform_1, window_bounds = array<i64: 64, 64>}, {transform_indices = @transform_2, window_bounds = array<i64: 1, 64>}, {transform_indices = @transform_3, window_bounds = array<i64: 4, 64>}]} {
    %c0 = arith.constant 0 : index
    %c0_0 = arith.constant 0 : index
    %0 = vector.load %arg2[%c0, %c0_0] : memref<4x64xbf16, #tpu.memory_space<vmem>>, vector<4x64xbf16>
    %cst = arith.constant 0.000000e+00 : bf16
    %1 = vector.broadcast %cst : bf16 to vector<4x64xbf16>
    %2 = arith.maximumf %0, %1 : vector<4x64xbf16>
    %c0_1 = arith.constant 0 : index
    %c0_2 = arith.constant 0 : index
    %3 = vector.load %arg3[%c0_1, %c0_2] : memref<64x64xbf16, #tpu.memory_space<vmem>>, vector<64x64xbf16>
    %cst_3 = arith.constant dense<0.000000e+00> : vector<4x64xf32>
    %4 = tpu.matmul %2, %3, %cst_3 {dimension_numbers = #tpu.dot_dimension_numbers<[1], [0], [0], [1], [0, 0, 1, 1], [], []>} : vector<4x64xbf16>, vector<64x64xbf16>, vector<4x64xf32> -> vector<4x64xf32>
    %c0_4 = arith.constant 0 : index
    %c0_5 = arith.constant 0 : index
    %5 = vector.load %arg4[%c0_4, %c0_5] : memref<1x64xf32, #tpu.memory_space<vmem>>, vector<1x64xf32>
    %6 = vector.broadcast %5 : vector<1x64xf32> to vector<4x64xf32>
    %7 = arith.addf %4, %6 : vector<4x64xf32>
    %c0_6 = arith.constant 0 : index
    %c0_7 = arith.constant 0 : index
    %8 = vector.load %arg5[%c0_6, %c0_7] : memref<4x64xf32, #tpu.memory_space<vmem>>, vector<4x64xf32>
    tpu.vector_store %arg5[%c0_6, %c0_7], %7 {strides = array<i32>} : memref<4x64xf32, #tpu.memory_space<vmem>>, vector<4x64xf32>,
    return
  }
  func.func @transform_0(%arg0: i32, %arg1: i32) -> (i32, i32) {
    %c0_i32 = arith.constant 0 : i32
    %c0_i32_0 = arith.constant 0 : i32
    return %arg0, %c0_i32 : i32, i32
  }
  func.func @transform_1(%arg0: i32, %arg1: i32) -> (i32, i32) {
    %c0_i32 = arith.constant 0 : i32
    %c0_i32_0 = arith.constant 0 : i32
    return %c0_i32, %arg1 : i32, i32
  }
  func.func @transform_2(%arg0: i32, %arg1: i32) -> (i32, i32) {
    %c0_i32 = arith.constant 0 : i32
    %c0_i32_0 = arith.constant 0 : i32
    return %c0_i32, %arg1 : i32, i32
  }
  func.func @transform_3(%arg0: i32, %arg1: i32) -> (i32, i32) {
    %c0_i32 = arith.constant 0 : i32
    return %arg0, %arg1 : i32, i32
  }
}

</mosaic_0001>

<bundles_post_ra>
// kernel: model_forward.8
= control target key start
LH: loop header
LB: loop body
LE: loop exit
PB: predicated region body
PF: predicated region fallthrough
CT: control target
= control target key end

     0   :  { %v137_v0 = vmov 0.0   ;;  %vm138_vm0 = vmmov 0   ;;  %v139_v6 = vmov 0   ;;  %vm56_vm1 = vcmask 523264   ;;  %s181_s1 = inlined_call_operand.vmem [shape: bf16[64,64], index: 1, kind: input, shape index: {}]   ;;  %s182_s0 = inlined_call_operand.vmem [shape: bf16[4,64], index: 0, kind: input, shape index: {}]   ;;  %s183_s2 = inlined_call_operand.vmem [shape: f32[1,64], index: 2, kind: input, shape index: {}]   ;;  %s184_s3 = inlined_call_operand.vmem [shape: bf16[4,64], index: 3, kind: output, shape index: {}]  }
   0x1   :  { %118 = vmatprep.subr.bf16.mxu0 %v137_v0  ;;  %v133_v1 = vld [vmem:[%s181_s1 + $0x18] sm:$0xff]   ;;  %126 = vmatprep.mubr.msk.bf16.mxu0 %vm138_vm0, %v137_v0  ;;  %v134_v2 = vld [vmem:[%s181_s1 + $0x10] sm:$0xff]   ;;  %v135_v3 = vld [vmem:[%s181_s1 + $0x8] sm:$0xff]   ;;  %vm101_vm2 = vcmask 517120  }
   0x2   :  { %119 = vmatpush3.bf16.msra.mxu0 %v133_v1  ;;  %v136_v4 = vld [vmem:[%s181_s1] sm:$0xff]  }
   0x3   :  { %120 = vmatprep.subr.bf16.mxu0 %v137_v0  ;;  %v15_v5 = vld [vmem:[%s182_s0] sm:$0x3] }
   0x4   :  { %v16_v7 = vmax.bf16 %v139_v6, %v15_v5  ;;  %v107_v8 = vld [vmem:[%s183_s2] ss:$0 sm:$0xff] }
   0x6   :  { %121 = vmatpush3.bf16.msra.mxu0 %v134_v2 }
   0x7   :  { %122 = vmatprep.subr.bf16.mxu0 %v137_v0 }
   0xa   :  { %123 = vmatpush3.bf16.msra.mxu0 %v135_v3 }
   0xb   :  { %124 = vmatprep.subr.bf16.mxu0 %v137_v0 }
   0xe   :  { %125 = vmatpush3.bf16.msra.mxu0 %v136_v4 }
  0x11   :  { %127 = vmatmul.mubr.msk.bf16.vlgmr.msra.gmra.mxu0 %vm56_vm1, %v16_v7 }
  0xd1   :  { %v94_v9 = vpop.f32.mrf.mxu0 }
  0xd2   :  { %v95_v10 = vadd.f32 %v107_v8, %v94_v9 }
  0xd3   :  { %v128_v11 = vpop.f32.mrf.mxu0 }
  0xd4   :  { %v100_v12 = vpack.c.bf16 %v95_v10, %v95_v10 }
  0xd5   :  { %v97_v13 = vpop.f32.mrf.mxu0 }
  0xd6   :  { %102 = vst.msk [vmem:[%s184_s3] sm:$0x3] %vm101_vm2, %v100_v12 }
  0xd7   :  { %v129_v14 = vpop.f32.mrf.mxu0 }

// kernel: model_forward.5
= control target key start
LH: loop header
LB: loop body
LE: loop exit
PB: predicated region body
PF: predicated region fallthrough
CT: control target
= control target key end

     0   :  { %vm44_vm0 = vcmask 261120   ;;  %vm120_vm1 = vcmask 257024   ;;  %s209_s1 = inlined_call_operand.vmem [shape: bf16[32,32], index: 1, kind: input, shape index: {}]   ;;  %s210_s0 = inlined_call_operand.vmem [shape: f32[32,32], index: 0, kind: input, shape index: {}]   ;;  %s211_s2 = inlined_call_operand.vmem [shape: f32[1,32], index: 2, kind: input, shape index: {}]   ;;  %s212_s3 = inlined_call_operand.vmem [shape: bf16[32,32], index: 3, kind: output, shape index: {}]  }
   0x1   :  { %v154_v0 = vld [vmem:[%s209_s1 + $0x8] sm:$0xff]   ;;  %v155_v1 = vld [vmem:[%s209_s1] sm:$0xff]   ;;  %v17_v5 = vld [vmem:[%s210_s0 + $0x10] sm:$0xff] }
   0x2   :  { %146 = vmatprep.subr.bf16.mxu0 %v154_v0  ;;  %v15_v2 = vld [vmem:[%s210_s0] sm:$0xff]  ;;  %v16_v3 = vld [vmem:[%s210_s0 + $0x8] sm:$0xff]  ;;  %v18_v6 = vld [vmem:[%s210_s0 + $0x18] sm:$0xff] }
   0x3   :  { %147 = vmatpush3.bf16.msra.mxu0 %v154_v0  ;;  %v19_v4 = vpack.c.bf16 %v16_v3, %v15_v2  ;;  %v20_v7 = vpack.c.bf16 %v18_v6, %v17_v5  ;;  %v129_v8 = vld [vmem:[%s211_s2] ss:$0 sm:$0xff] }
   0x4   :  { %148 = vmatprep.subr.bf16.mxu0 %v155_v1 }
   0x5   :  { %150 = vmatprep.mubr.msk.bf16.mxu0 %vm44_vm0, %v19_v4 }
   0x7   :  { %149 = vmatpush3.bf16.msra.mxu0 %v155_v1 }
   0xa   :  { %151 = vmatmul.mubr.msk.bf16.vlgmr.msra.gmra.mxu0 %vm44_vm0, %v20_v7 }
  0xca   :  { %v152_v9 = vpop.f32.mrf.mxu0 }
  0xcb   :  { %v94_v10 = vadd.f32 %v152_v9, %v129_v8 }
  0xcc   :  { %v85_v11 = vpop.f32.mrf.mxu0 }
  0xcd   :  { %v102_v12 = vmax.f32 %v94_v10, 0.0  ;;  %v86_v13 = vadd.f32 %v129_v8, %v85_v11 }
  0xce   :  { %v153_v14 = vpop.f32.mrf.mxu0 }
  0xcf   :  { %v140_v15 = vpack.c.bf16 %v102_v12, %v102_v12  ;;  %v100_v16 = vmax.f32 %v86_v13, 0.0  ;;  %v97_v17 = vadd.f32 %v153_v14, %v129_v8 }
  0xd0   :  { %v88_v18 = vpop.f32.mrf.mxu0 }
  0xd1   :  { %123 = vst.msk [vmem:[%s212_s3 + $0x8] sm:$0xf] %vm120_vm1, %v140_v15  ;;  %v138_v19 = vpack.c.bf16 %v100_v16, %v100_v16  ;;  %v103_v20 = vmax.f32 %v97_v17, 0.0  ;;  %v89_v21 = vadd.f32 %v129_v8, %v88_v18 }
  0xd3   :  { %121 = vst.msk [vmem:[%s212_s3] sm:$0xf] %vm120_vm1, %v138_v19  ;;  %v141_v22 = vpack.c.bf16 %v103_v20, %v103_v20  ;;  %v101_v23 = vmax.f32 %v89_v21, 0.0 }
  0xd5   :  { %124 = vst.msk [vmem:[%s212_s3 + $0xc] sm:$0xf] %vm120_vm1, %v141_v22  ;;  %v139_v24 = vpack.c.bf16 %v101_v23, %v101_v23 }
  0xd7   :  { %122 = vst.msk [vmem:[%s212_s3 + $0x4] sm:$0xf] %vm120_vm1, %v139_v24 }

// kernel: model_forward.7
= control target key start
LH: loop header
LB: loop body
LE: loop exit
PB: predicated region body
PF: predicated region fallthrough
CT: control target
= control target key end

     0   :  { %s1674_s0 = inlined_call_operand.vmem [shape: bf16[2,32,32], index: 0, kind: input, shape index: {}]   ;;  %s1675_s1 = inlined_call_operand.vmem [shape: bf16[2,2,32,128], index: 1, kind: input, shape index: {}]   ;;  %s1676_s2 = inlined_call_operand.vmem [shape: bf16[2,32,128], index: 2, kind: input, shape index: {}]   ;;  %s1677_s3 = inlined_call_operand.vmem [shape: f32[2,1,128], index: 3, kind: input, shape index: {}]   ;;  %s1678_s4 = inlined_call_operand.vmem [shape: bf16[2,8,4,32], index: 4, kind: output, shape index: {}]  }
   0x1   :  { %1682 = sst [smem:[#allocation9_spill]] %s1674_s0 }
   0x2   :  { %s1445_s15 = smov 0   ;;  %s1447_s16 = smov 0  }
   0x3   :  { %s1449_s17 = smov 0   ;;  %s1451_s18 = smov 0  }
   0x4   :  { %s1453_s19 = smov 0   ;;  %s1455_s20 = smov 0  }
   0x5   :  { %s1457_s21 = smov 0  }
   0x6 LB: > { %1683 = sst [smem:[#allocation6_spill]] %s1407_s20  ;;  %s23_s22 = sadd.s32 1, %s1403_s19  ;;  %s1411_s21 = sphi %s1457_s21, %s14_s21   ;;  %s1407_s20 = sphi %s1455_s20, %s1694_s20   ;;  %s1403_s19 = sphi %s1453_s19, %s1693_s19   ;;  %s1399_s18 = sphi %s1451_s18, %s1687_s18   ;;  %s1395_s17 = sphi %s1449_s17, %s1692_s17   ;;  %s1391_s16 = sphi %s1447_s16, %s1691_s16   ;;  %s1387_s15 = sphi %s1445_s15, %s1690_s15  }
   0x7   : > { %s26_s23 = sadd.s32 1, %s1407_s20  ;;  %p24_p0 = scmp.ge.s32.totalorder %s23_s22, 2 }
   0x8   : > { %s1124_s24 = sshll.u32 %s1403_s19, 1  ;;  %p48_p2 = scmp.ne.s32.totalorder %s1391_s16, %s1387_s15 }
   0x9   : > { %s31_s25 = ssub.s32 1, %s1124_s24  ;;  %s1696_s22 = smov (%p24_p0, %s23_s22), 0 }
   0xa   : > { %1684 = sst [smem:[#allocation7_spill]] %s1696_s22  ;;  %s1698_s23 = smov (!%p24_p0, %s26_s23), %s1407_s20 }
   0xb   : > { %s1125_s26 = sshll.u32 %s1696_s22, 1  ;;  %p28_p1 = scmp.ge.s32.totalorder %s1698_s23, 2 }
   0xc   : > { %s32_s27 = smul.u32 %s1407_s20, %s31_s25  ;;  %s35_s28 = ssub.s32 1, %s1125_s26 }
   0xd   : > { %s1700_s23 = smov (%p28_p1, %s1698_s23), 0  ;;  %p49_p3 = scmp.eq.s32.totalorder %s1411_s21, 0 }
   0xe   : > { %1685 = sst [smem:[#allocation8_spill]] %s1700_s23  ;;  %s33_s29 = sadd.s32 %s1403_s19, %s32_s27 }
   0xf   : > { %s36_s30 = smul.u32 %s35_s28, %s1700_s23  ;;  %p50_p4 = por %p49_p3, %p48_p2 }
  0x10   : > { %s41_s7 = sadd.s32 1, %s1391_s16  ;;  %p1129_p6 = scmp.ge.s32.totalorder %s1411_s21, 4 }
  0x11   : > { %s37_s5 = sadd.s32 %s36_s30, %s1696_s22 }
  0x12   : > { %s38_s6 = ssub.s32 %s33_s29, %s37_s5  ;;  %188 = sbr.rel (%p1129_p6) target bundleno = 34 (0x22), region = 16 }
  0x13   : > { %p39_p5 = scmp.eq.s32.totalorder %s38_s6, 0 }
  0x15   : > { %s1498_s8 = scalar_select %p39_p5, %s1391_s16, %s41_s7  }
  0x17   : > { %191 = sbr.rel (!%p50_p4) target bundleno = 34 (0x22), region = 20  ;;  %s193_s9 = sand.u32 (%p50_p4), 1, %s1391_s16  }
  0x18   : > { %s1184_s10 = sshll.u32 (%p50_p4), %s33_s29, 3  ;;  %s1130_s11 = sshll.u32 (%p50_p4), %s193_s9, 4 }
  0x19   : > { %s1686_s0 = sld [smem:[#allocation9_spill]] (%p50_p4)  ;;  %s195_s24 = scalar_lea.vmem (%p50_p4), [#allocation5], %s1130_s11 }
  0x1f   : > { %s202_s14 = scalar_lea.vmem %s1686_s0, %s1184_s10 }
  0x20   : > { %v219_v0 = vld [vmem:[%s202_s14] sm:$0xff]   ;;  %v223_v1 = vld [vmem:[%s202_s14 + $0x10] sm:$0xff]  }
  0x21   : > { %220 = vst [vmem:[%s195_s24] sm:$0xff] %v219_v0   ;;  %224 = vst [vmem:[%s195_s24 + $0x8] sm:$0xff] %v223_v1  }
  0x22 PF: > { %p1134_p7 = scmp.ge.s32.totalorder %s1411_s21, 1  ;;  %p279_p8 = scmp.lt.s32.totalorder %s1411_s21, 5 }
  0x24   : > { %p280_p9 = pnand %p1134_p7, %p279_p8 }
  0x25   : > { %s286_s25 = sand.u32 (!%p280_p9), 1, %s1387_s15   ;;  %p337_p10 = scmp.lt.s32.totalorder (!%p280_p9), %s1399_s18, 1 }
  0x26   : > { %283 = sbr.rel (%p280_p9) target bundleno = 2873 (0xb39), region = 73  ;;  %s1509_s26 = sshll.u32 (!%p280_p9), %s286_s25, 4 }
  0x27   : > { %s1140_s27 = sshll.u32 (!%p280_p9), %s1395_s17, 1  ;;  %s288_s7 = scalar_lea.vmem (!%p280_p9), [#allocation5], %s1509_s26 }
  0x28   : > { %s351_s28 = ssub.s32 (!%p280_p9), 1, %s1140_s27  ;;  %p1144_p12 = scmp.ne.s32.totalorder (!%p280_p9), %s1395_s17, 0 }
  0x29   : > { %s352_s30 = smul.u32 (!%p280_p9), %s1399_s18, %s351_s28 }
  0x2b   : > { %s1513_s29 = scalar_select %p337_p10, %s1399_s18, 1 }
  0x2c   : > { %s353_s25 = sadd.s32 %s1395_s17, %s352_s30 }
  0x2d   : > { %s1185_s5 = sshll.u32 %s1513_s29, 5  ;;  %s1186_s6 = sshll.u32 %s1513_s29, 4 }
  0x2e   : > { %s341_s10 = scalar_lea.vmem %s1675_s1, %s1185_s5  ;;  %s1524_s12 = scalar_lea.vmem %s1676_s2, %s1186_s6 }
  0x2f   : > { %s349_s24 = scalar_lea.vmem %s1677_s3, %s1513_s29  ;;  %s1141_s27 = sshll.u32 %s353_s25, 2 }
  0x30   : > { %p357_p11 = scmp.lt.s32.totalorder %s1141_s27, 7  ;;  %s1142_s0 = sshll.u32 %s1513_s29, 3 }
  0x31   : > { %372 = sbr.rel (%p1144_p12) target bundleno = 56 (0x38), region = 81 }
  0x32   : > { %s1702_s27 = smov (!%p357_p11, %s1141_s27), 7 }
  0x33   : > { %s360_s28 = sadd.s32 %s1142_s0, %s1702_s27 }
  0x34   : > { %s1143_s23 = sshll.u32 %s360_s28, 1 }
  0x35   : > { %s1535_s5 = scalar_lea.vmem %s1678_s4, %s1143_s23 }
  0x36   : > { %vm373_vm0 = vcmask 257024   ;;  %v1413_v2 = vmov 0.0  }
  0x37   : > { %374 = vst.msk [vmem:[#allocation3] sm:$0xf] %vm373_vm0, %v1413_v2  ;;  %375 = vst.msk [vmem:[#allocation4] sm:$0xf] %vm373_vm0, %v1413_v2 }
  0x38 PF: > { %v1317_v3 = vld [vmem:[%s341_s10 + $0x18] sm:$0xff]   ;;  %v1414_v4 = vmov 0.0   ;;  %v1318_v5 = vld [vmem:[%s341_s10 + $0x8] sm:$0xff]   ;;  %v1319_v6 = vld [vmem:[%s341_s10 + $0x10] sm:$0xff]   ;;  %vm1415_vm1 = vmmov 0   ;;  %vm407_vm2 = vcmask 261120  }
  0x39   : > { %1206 = vmatprep.subr.bf16.mxu0 %v1414_v4  ;;  %1214 = vmatprep.subr.bf16.mxu1 %v1414_v4  ;;  %v1320_v7 = vld [vmem:[%s341_s10] sm:$0xff]   ;;  %v1322_v9 = vld [vmem:[%s288_s7] sm:$0xff]   ;;  %s1160_s20 = smul.u32 12, %s1399_s18  ;;  %s1416_s23 = smov 32   ;;  %vm628_vm3 = vcmask 257024   ;;  %vm649_vm4 = vcmask 254976  }
  0x3a   : > { %1207 = vmatpush3.bf16.msra.mxu0 %v1317_v3  ;;  %1210 = vmatprep.mubr.msk.bf16.mxu0 %vm1415_vm1, %v1414_v4  ;;  %v1321_v8 = vld [vmem:[%s288_s7 + $0x8] sm:$0xff]   ;;  %v1548_v10 = vld [vmem:[%s1524_s12 + $0x8] sm:$0xff]   ;;  %s1417_s26 = smov 96   ;;  %s1418_s29 = smov 64  }
  0x3b   : > { %1215 = vmatpush3.bf16.msra.mxu1 %v1318_v5  ;;  %1208 = vmatprep.subr.bf16.mxu0 %v1414_v4  ;;  %v1556_v11 = vld [vmem:[%s1524_s12] sm:$0xff]   ;;  %s535_s22 = scalar_lea.vmem [#allocation2], %s1160_s20  ;;  %s1166_s30 = sshll.u32 %s1399_s18, 2 }
  0x3c   : > { %1216 = vmatprep.subr.bf16.mxu1 %v1414_v4  ;;  %1218 = vmatprep.mubr.msk.bf16.mxu1 %vm1415_vm1, %v1414_v4  ;;  %v1159_v16 = vld [vmem:[%s349_s24] ss:$0 sm:$0xff]  ;;  %s1043_s6 = scalar_lea.vmem [#allocation2], %s1166_s30  ;;  %s755_s9 = ssub.s32 2, %s1399_s18 }
  0x3d   : > { %s1172_s10 = sshll.u32 %s755_s9, 2  ;;  %s1176_s11 = smul.u32 4294967284, %s1399_s18 }
  0x3e   : > { %1209 = vmatpush3.bf16.msra.mxu0 %v1319_v6  ;;  %v537_v12 = vld [vmem:[#allocation3] sm:$0xf]  ;;  %v602_v34 = vld [vmem:[#allocation4] sm:$0xf]  ;;  %s757_s15 = scalar_lea.vmem [#allocation2], %s1172_s10  ;;  %s1187_s13 = smul.u32 6, %s1399_s18 }
  0x3f   : > { %1217 = vmatpush3.bf16.msra.mxu1 %v1320_v7  ;;  %1222 = vmatprep.subr.bf16.mxu0 %v1414_v4  ;;  %v538_v13 = vpack.c.bf16 %v537_v12, %v537_v12  ;;  %s1054_s12 = scalar_lea.vmem [#allocation2], %s1176_s11  ;;  %s1170_s24 = sshll.u32 %s1399_s18, 1 }
  0x40   : > { %1230 = vmatprep.subr.bf16.mxu1 %v1414_v4  ;;  %s648_s14 = scalar_lea.vmem %s1535_s5, %s1187_s13  ;;  %s1175_s25 = sshll.u32 %s755_s9, 1 }
  0x41   : > { %1211 = vmatmul.mubr.msk.bf16.vlgmr.msra.gmra.mxu0 %vm407_vm2, %v1321_v8  ;;  %s1046_s27 = scalar_lea.vmem %s1535_s5, %s1170_s24  ;;  %s857_s28 = scalar_lea.vmem %s1535_s5, %s1175_s25 }
  0x42   : > { %1219 = vmatmul.mubr.msk.bf16.vlgmr.msra.gmra.mxu1 %vm407_vm2, %v1322_v9  ;;  %1223 = vmatpush3.bf16.msra.mxu0 %v1548_v10  ;;  %s1180_s7 = smul.u32 4294967290, %s1399_s18 }
  0x43   : > { %1224 = vmatprep.subr.bf16.mxu0 %v1414_v4  ;;  %1226 = vmatprep.mubr.msk.bf16.mxu0 %vm1415_vm1, %v1414_v4 }
  0x44   : > { %1231 = vmatpush3.bf16.msra.mxu1 %v1548_v10  ;;  %1234 = vmatprep.mubr.msk.bf16.mxu1 %vm1415_vm1, %v1414_v4  ;;  %s1058_s0 = scalar_lea.vmem %s1535_s5, %s1180_s7 }
  0x45   : > { %1232 = vmatprep.subr.bf16.mxu1 %v1414_v4 }
  0x46   : > { %1225 = vmatpush3.bf16.msra.mxu0 %v1556_v11 }
  0x47   : > { %1238 = vmatprep.subr.bf16.mxu0 %v1414_v4 }
  0x48   : > { %1233 = vmatpush3.bf16.msra.mxu1 %v1556_v11 }
  0x49   : > { %1227 = vmatmul.mubr.msk.bf16.vlgmr.msra.gmra.mxu0 %vm407_vm2, %v538_v13  ;;  %1246 = vmatprep.subr.bf16.mxu1 %v1414_v4 }
  0x4a   : > { %1239 = vmatpush3.bf16.msra.mxu0 %v1548_v10  ;;  %1242 = vmatprep.mubr.msk.bf16.mxu0 %vm1415_vm1, %v1414_v4 }
  0x4b   : > { %1240 = vmatprep.subr.bf16.mxu0 %v1414_v4 }
  0x4e   : > { %1241 = vmatpush3.bf16.msra.mxu0 %v1556_v11 }
 0x101   : > { %v445_v14 = vpop.f32.mrf.mxu0 }
 0x102   : > { %v506_v15 = vpop.f32.mrf.mxu1 }
 0x103   : > { %v507_v17 = vadd.f32 %v506_v15, %v445_v14  ;;  %v1212_v18 = vpop.f32.mrf.mxu0 }
 0x104   : > { %v1220_v19 = vpop.f32.mrf.mxu1 }
 0x105   : > { %v520_v20 = vadd.f32 %v1159_v16, %v507_v17  ;;  %v448_v21 = vpop.f32.mrf.mxu0 }
 0x106   : > { %v509_v22 = vpop.f32.mrf.mxu1 }
 0x107   : > { %522 = vst [vmem:[#allocation2] sm:$0xff] %v520_v20   ;;  %v510_v23 = vadd.f32 %v509_v22, %v448_v21  ;;  %v1213_v24 = vpop.f32.mrf.mxu0 }
 0x108   : > { %v1221_v25 = vpop.f32.mrf.mxu1 }
 0x109   : > { %v521_v26 = vadd.f32 %v1159_v16, %v510_v23  ;;  %v588_v27 = vpop.f32.mrf.mxu0 }
 0x10b   : > { %526 = vst [vmem:[#allocation2 + $0x8] sm:$0xff] %v521_v26   ;;  %v1228_v28 = vpop.f32.mrf.mxu0 }
 0x10d   : > { %v591_v29 = vpop.f32.mrf.mxu0 }
 0x10f   : > { %v1229_v30 = vpop.f32.mrf.mxu0 }
 0x112   : > { %v536_v31 = vld [vmem:[%s535_s22] sm:$0xf]  ;;  %v1167_v53 = vld [vmem:[%s1043_s6 + $0x4] sm:$0xf] }
 0x113   : > { %v594_v32 = vadd.f32 %v588_v27, %v536_v31  ;;  %v758_v14 = vld [vmem:[%s757_s15] sm:$0xf] }
 0x115   : > { %1325 = vtanh.f32 %v594_v32  ;;  %v1164_v35 = vmul.f32 -1.442695, %v594_v32 }
 0x117   : > { %1327 = vpow2.f32 %v1164_v35 }
 0x122   : > { %v1326_v33 = vpop.eup %1325 }
 0x123   : > { %609 = vrot.lane.b32.xlu0 %v1326_v33, %s1416_s23 }
 0x124   : > { %v1328_v36 = vpop.eup %1327 }
 0x125   : > { %v598_v37 = vadd.f32 1.0, %v1328_v36 }
 0x127   : > { %604 = vrot.lane.b32.xlu0 %v602_v34, %s1416_s23  ;;  %1329 = vrcp.f32 %v598_v37 }
 0x134   : > { %v1330_v38 = vpop.eup %1329 }
 0x195   : > { %v610_v39 = vpop.permute.xlu0 %609 }
 0x196   : > { %v612_v40 = vmul.f32 %v1330_v38, %v610_v39  ;;  %v1177_v39 = vld [vmem:[%s1054_s12 + $0xc] sm:$0xf] }
 0x198   : > { %614 = vrot.lane.b32.xlu1 %v612_v40, %s1416_s23 }
 0x199   : > { %v605_v41 = vpop.permute.xlu0 %604 }
 0x19a   : > { %v607_v42 = vmul.f32 %v1330_v38, %v605_v41 }
 0x20a   : > { %v615_v43 = vpop.permute.xlu1 %614 }
 0x20b   : > { %v617_v44 = vadd.f32 %v615_v43, %v607_v42 }
 0x20d   : > { %1331 = vtanh.f32 %v617_v44 }
 0x21a   : > { %v1332_v45 = vpop.eup %1331 }
 0x21b   : > { %620 = vrot.lane.b32.xlu1 %v1332_v45, %s1416_s23 }
 0x21f   : > { %625 = vrot.lane.b32.xlu1 %v617_v44, %s1417_s26 }
 0x28d   : > { %v621_v46 = vpop.permute.xlu1 %620 }
 0x28e   : > { %v1586_v47 = vmul.f32 %v1330_v38, %v621_v46 }
 0x290   : > { %631 = vrot.lane.b32.xlu0 %v1586_v47, %s1418_s29 }
 0x291   : > { %v626_v48 = vpop.permute.xlu1 %625 }
 0x292   : > { %629 = vst.msk [vmem:[#allocation4] sm:$0xf] %vm628_vm3, %v626_v48 }
 0x299   : > { %v708_v49 = vld [vmem:[#allocation4] sm:$0xf] }
 0x29a   : > { %710 = vrot.lane.b32.xlu1 %v708_v49, %s1416_s23 }
 0x302   : > { %v632_v50 = vpop.permute.xlu0 %631 }
 0x303   : > { %634 = vst.msk [vmem:[#allocation3] sm:$0xf] %vm628_vm3, %v632_v50  ;;  %v1419_v50 = vmov 1983009808  }
 0x30a   : > { %v655_v51 = vld [vmem:[#allocation3] sm:$0xf] }
 0x30b   : > { %v656_v52 = vpack.c.bf16 %v655_v51, %v655_v51  ;;  %v638_v51 = vunpack.c.l.s4 %v1419_v50 }
 0x30c   : > { %v711_v2 = vpop.permute.xlu1 %710 }
 0x30d   : > { %1235 = vmatmul.mubr.msk.bf16.vlgmr.msra.gmra.mxu1 %vm407_vm2, %v656_v52  ;;  %v640_v52 = vlaneseq }
 0x30e   : > { %1247 = vmatpush3.bf16.msra.mxu1 %v1548_v10  ;;  %1250 = vmatprep.mubr.msk.bf16.mxu1 %vm1415_vm1, %v1414_v4 }
 0x30f   : > { %1248 = vmatprep.subr.bf16.mxu1 %v1414_v4 }
 0x312   : > { %1249 = vmatpush3.bf16.msra.mxu1 %v1556_v11 }
 0x3cd   : > { %v694_v54 = vpop.f32.mrf.mxu1 }
 0x3ce   : > { %v700_v55 = vadd.f32 %v1167_v53, %v694_v54  ;;  %v639_v53 = vunpack.c.0.s8 %v638_v51  ;;  %v641_v54 = vshrl.u32 %v640_v52, 7 }
 0x3cf   : > { %v1236_v56 = vpop.f32.mrf.mxu1 }
 0x3d0   : > { %1333 = vtanh.f32 %v700_v55  ;;  %v1169_v60 = vmul.f32 -1.442695, %v700_v55 }
 0x3d1   : > { %v697_v57 = vpop.f32.mrf.mxu1 }
 0x3d2   : > { %1335 = vpow2.f32 %v1169_v60  ;;  %v635_v57 = vpack.c.bf16 %v1586_v47, %v1586_v47 }
 0x3d3   : > { %v1237_v58 = vpop.f32.mrf.mxu1 }
 0x3dd   : > { %v1334_v59 = vpop.eup %1333 }
 0x3de   : > { %715 = vrot.lane.b32.xlu0 %v1334_v59, %s1416_s23  ;;  %v642_v59 = vsub.s32 %v639_v53, %v641_v54 }
 0x3df   : > { %v1336_v61 = vpop.eup %1335 }
 0x3e0   : > { %v704_v62 = vadd.f32 1.0, %v1336_v61  ;;  %v643_v61 = vrot.slane %v635_v57, %v642_v59 }
 0x3e2   : > { %1337 = vrcp.f32 %v704_v62 }
 0x3ef   : > { %v1338_v63 = vpop.eup %1337 }
 0x3f0   : > { %v713_v3 = vmul.f32 %v1338_v63, %v711_v2 }
 0x450   : > { %v716_v0 = vpop.permute.xlu0 %715 }
 0x451   : > { %v718_v1 = vmul.f32 %v1338_v63, %v716_v0 }
 0x453   : > { %720 = vrot.lane.b32.xlu0 %v718_v1, %s1416_s23 }
 0x4c5   : > { %v721_v4 = vpop.permute.xlu0 %720 }
 0x4c6   : > { %v723_v5 = vadd.f32 %v721_v4, %v713_v3 }
 0x4c8   : > { %1339 = vtanh.f32 %v723_v5 }
 0x4d5   : > { %v1340_v6 = vpop.eup %1339 }
 0x4d6   : > { %726 = vrot.lane.b32.xlu1 %v1340_v6, %s1416_s23 }
 0x4da   : > { %731 = vrot.lane.b32.xlu1 %v723_v5, %s1417_s26 }
 0x548   : > { %v727_v7 = vpop.permute.xlu1 %726 }
 0x549   : > { %v1604_v8 = vmul.f32 %v1338_v63, %v727_v7 }
 0x54b   : > { %736 = vrot.lane.b32.xlu0 %v1604_v8, %s1418_s29  ;;  %v740_v3 = vpack.c.bf16 %v1604_v8, %v1604_v8 }
 0x54c   : > { %v732_v9 = vpop.permute.xlu1 %731 }
 0x54d   : > { %734 = vst.msk [vmem:[#allocation4] sm:$0xf] %vm628_vm3, %v732_v9  ;;  %v748_v5 = vrot.slane %v740_v3, %v642_v59 }
 0x554   : > { %v812_v10 = vld [vmem:[#allocation4] sm:$0xf] }
 0x555   : > { %814 = vrot.lane.b32.xlu1 %v812_v10, %s1416_s23 }
 0x5bd   : > { %v737_v11 = vpop.permute.xlu0 %736 }
 0x5be   : > { %739 = vst.msk [vmem:[#allocation3] sm:$0xf] %vm628_vm3, %v737_v11 }
 0x5c5   : > { %v759_v12 = vld [vmem:[#allocation3] sm:$0xf] }
 0x5c6   : > { %v760_v13 = vpack.c.bf16 %v759_v12, %v759_v12 }
 0x5c7   : > { %v815_v27 = vpop.permute.xlu1 %814 }
 0x5c8   : > { %1243 = vmatmul.mubr.msk.bf16.vlgmr.msra.gmra.mxu0 %vm407_vm2, %v760_v13 }
 0x688   : > { %v798_v15 = vpop.f32.mrf.mxu0 }
 0x689   : > { %v804_v16 = vadd.f32 %v798_v15, %v758_v14 }
 0x68a   : > { %v1244_v17 = vpop.f32.mrf.mxu0 }
 0x68b   : > { %1341 = vtanh.f32 %v804_v16  ;;  %v1174_v21 = vmul.f32 -1.442695, %v804_v16 }
 0x68c   : > { %v801_v18 = vpop.f32.mrf.mxu0 }
 0x68d   : > { %1343 = vpow2.f32 %v1174_v21 }
 0x68e   : > { %v1245_v19 = vpop.f32.mrf.mxu0 }
 0x698   : > { %v1342_v20 = vpop.eup %1341 }
 0x699   : > { %819 = vrot.lane.b32.xlu0 %v1342_v20, %s1416_s23 }
 0x69a   : > { %v1344_v22 = vpop.eup %1343 }
 0x69b   : > { %v808_v23 = vadd.f32 1.0, %v1344_v22 }
 0x69d   : > { %1345 = vrcp.f32 %v808_v23 }
 0x6aa   : > { %v1346_v24 = vpop.eup %1345 }
 0x6ab   : > { %v817_v28 = vmul.f32 %v1346_v24, %v815_v27 }
 0x70b   : > { %v820_v25 = vpop.permute.xlu0 %819 }
 0x70c   : > { %v822_v26 = vmul.f32 %v1346_v24, %v820_v25 }
 0x70e   : > { %824 = vrot.lane.b32.xlu0 %v822_v26, %s1416_s23 }
 0x780   : > { %v825_v29 = vpop.permute.xlu0 %824 }
 0x781   : > { %v827_v30 = vadd.f32 %v825_v29, %v817_v28 }
 0x783   : > { %1347 = vtanh.f32 %v827_v30 }
 0x790   : > { %v1348_v31 = vpop.eup %1347 }
 0x791   : > { %830 = vrot.lane.b32.xlu1 %v1348_v31, %s1416_s23 }
 0x795   : > { %835 = vrot.lane.b32.xlu1 %v827_v30, %s1417_s26 }
 0x803   : > { %v831_v32 = vpop.permute.xlu1 %830 }
 0x804   : > { %v833_v33 = vmul.f32 %v1346_v24, %v831_v32 }
 0x806   : > { %840 = vrot.lane.b32.xlu0 %v833_v33, %s1418_s29  ;;  %v844_v60 = vpack.c.bf16 %v833_v33, %v833_v33 }
 0x807   : > { %v836_v34 = vpop.permute.xlu1 %835 }
 0x808   : > { %838 = vst.msk [vmem:[#allocation4] sm:$0xf] %vm628_vm3, %v836_v34  ;;  %v852_v62 = vrot.slane %v844_v60, %v642_v59 }
 0x80f   : > { %v917_v35 = vld [vmem:[#allocation4] sm:$0xf] }
 0x810   : > { %919 = vrot.lane.b32.xlu1 %v917_v35, %s1416_s23 }
 0x878   : > { %v841_v36 = vpop.permute.xlu0 %840 }
 0x879   : > { %843 = vst.msk [vmem:[#allocation3] sm:$0xf] %vm628_vm3, %v841_v36 }
 0x880   : > { %v864_v37 = vld [vmem:[#allocation3] sm:$0xf] }
 0x881   : > { %v865_v38 = vpack.c.bf16 %v864_v37, %v864_v37 }
 0x882   : > { %v920_v63 = vpop.permute.xlu1 %919 }
 0x883   : > { %1251 = vmatmul.mubr.msk.bf16.vlgmr.msra.gmra.mxu1 %vm407_vm2, %v865_v38 }
 0x943   : > { %v903_v40 = vpop.f32.mrf.mxu1 }
 0x944   : > { %v909_v41 = vadd.f32 %v1177_v39, %v903_v40 }
 0x945   : > { %v1252_v42 = vpop.f32.mrf.mxu1 }
 0x946   : > { %1349 = vtanh.f32 %v909_v41  ;;  %v1179_v46 = vmul.f32 -1.442695, %v909_v41 }
 0x947   : > { %v906_v43 = vpop.f32.mrf.mxu1 }
 0x948   : > { %1351 = vpow2.f32 %v1179_v46 }
 0x949   : > { %v1253_v44 = vpop.f32.mrf.mxu1 }
 0x953   : > { %v1350_v45 = vpop.eup %1349 }
 0x954   : > { %924 = vrot.lane.b32.xlu0 %v1350_v45, %s1416_s23 }
 0x955   : > { %v1352_v48 = vpop.eup %1351 }
 0x956   : > { %v913_v49 = vadd.f32 1.0, %v1352_v48 }
 0x958   : > { %1353 = vrcp.f32 %v913_v49 }
 0x965   : > { %v1354_v55 = vpop.eup %1353 }
 0x966   : > { %v922_v0 = vmul.f32 %v1354_v55, %v920_v63 }
 0x9c6   : > { %v925_v56 = vpop.permute.xlu0 %924 }
 0x9c7   : > { %v927_v58 = vmul.f32 %v1354_v55, %v925_v56 }
 0x9c9   : > { %929 = vrot.lane.b32.xlu0 %v927_v58, %s1416_s23 }
 0x9cd   : > { %644 = vrot.lane.b32.xlu0 %v643_v61, %s1418_s29 }
 0x9d1   : > { %853 = vrot.lane.b32.xlu0 %v852_v62, %s1418_s29 }
 0xa3b   : > { %v930_v1 = vpop.permute.xlu0 %929 }
 0xa3c   : > { %v932_v2 = vadd.f32 %v930_v1, %v922_v0 }
 0xa3e   : > { %1355 = vtanh.f32 %v932_v2 }
 0xa3f   : > { %v645_v47 = vpop.permute.xlu0 %644 }
 0xa40   : > { %650 = vst.msk [vmem:[%s648_s14] sm:$0x3] %vm649_vm4, %v645_v47 }
 0xa43   : > { %v854_v10 = vpop.permute.xlu0 %853 }
 0xa4b   : > { %v1356_v4 = vpop.eup %1355 }
 0xa4c   : > { %935 = vrot.lane.b32.xlu1 %v1356_v4, %s1416_s23 }
 0xa50   : > { %749 = vrot.lane.b32.xlu1 %v748_v5, %s1418_s29 }
 0xa54   : > { %940 = vrot.lane.b32.xlu1 %v932_v2, %s1417_s26 }
 0xabe   : > { %v936_v6 = vpop.permute.xlu1 %935 }
 0xabf   : > { %v938_v7 = vmul.f32 %v1354_v55, %v936_v6 }
 0xac1   : > { %v949_v9 = vpack.c.bf16 %v938_v7, %v938_v7  ;;  %945 = vrot.lane.b32.xlu0 %v938_v7, %s1418_s29 }
 0xac2   : > { %v750_v8 = vpop.permute.xlu1 %749 }
 0xac3   : > { %1171 = vst.msk [vmem:[%s1046_s27 + $0x2] sm:$0x3] %vm649_vm4, %v750_v8  ;;  %v957_v11 = vrot.slane %v949_v9, %v642_v59 }
 0xac4   : > { %858 = vst.msk [vmem:[%s857_s28] sm:$0x3] %vm649_vm4, %v854_v10 }
 0xac5   : > { %958 = vrot.lane.b32.xlu1 %v957_v11, %s1418_s29 }
 0xac6   : > { %v941_v12 = vpop.permute.xlu1 %940 }
 0xac7   : > { %943 = vst.msk [vmem:[#allocation4] sm:$0xf] %vm628_vm3, %v941_v12 }
 0xb33   : > { %v946_v13 = vpop.permute.xlu0 %945 }
 0xb34   : > { %948 = vst.msk [vmem:[#allocation3] sm:$0xf] %vm628_vm3, %v946_v13 }
 0xb37   : > { %v959_v14 = vpop.permute.xlu1 %958 }
 0xb38   : > { %1181 = vst.msk [vmem:[%s1058_s0 + $0x6] sm:$0x3] %vm649_vm4, %v959_v14 }
 0xb39 PF: > { %s14_s21 = sadd.s32 1, %s1411_s21   ;;  %s1687_s18 = sld [smem:[#allocation6_spill]] }
 0xb3a   : > { %p11_p13 = scmp.ge.s32.totalorder %s14_s21, 6   ;;  %s1688_s20 = sld [smem:[#allocation7_spill]] }
 0xb3b   : > { %s1689_s22 = sld [smem:[#allocation8_spill]]  ;;  %s1690_s15 = smov %s1391_s16 }
 0xb3c   : > { %s1691_s16 = smov %s1498_s8  ;;  %s1692_s17 = smov %s1403_s19 }
 0xb3d   :  { %13 = sbr.rel (!%p11_p13) target bundleno = 6 (0x6), region = 138 }
 0xb40   : > { %s1693_s19 = smov %s1688_s20 }
 0xb41   : > { %s1694_s20 = smov %s1689_s22 }

// kernel: model_forward.6
= control target key start
LH: loop header
LB: loop body
LE: loop exit
PB: predicated region body
PF: predicated region fallthrough
CT: control target
= control target key end

     0   :  { %s1265_s15 = smov 0   ;;  %s1267_s16 = smov 0   ;;  %s1453_s0 = inlined_call_operand.vmem [shape: bf16[1,32,32], index: 0, kind: input, shape index: {}]   ;;  %s1454_s1 = inlined_call_operand.vmem [shape: bf16[2,1,32,128], index: 1, kind: input, shape index: {}]   ;;  %s1455_s2 = inlined_call_operand.vmem [shape: bf16[2,32,128], index: 2, kind: input, shape index: {}]   ;;  %s1456_s3 = inlined_call_operand.vmem [shape: f32[2,1,128], index: 3, kind: input, shape index: {}]   ;;  %s1457_s4 = inlined_call_operand.vmem [shape: bf16[2,8,4,32], index: 4, kind: output, shape index: {}]  }
   0x1   :  { %1458 = sst [smem:[#allocation5_spill]] %s1454_s1  ;;  %s1269_s17 = smov 0  }
   0x2   :  { %s1271_s18 = smov 0   ;;  %s1273_s19 = smov 0  }
   0x3 LB: > { %s23_s20 = sadd.s32 1, %s1223_s17  ;;  %s26_s21 = sadd.s32 1, %s1227_s18  ;;  %s1231_s19 = sphi %s1273_s19, %s14_s19   ;;  %s1227_s18 = sphi %s1271_s18, %s1463_s18   ;;  %s1223_s17 = sphi %s1269_s17, %s1462_s17   ;;  %s1219_s16 = sphi %s1267_s16, %s1461_s16   ;;  %s1215_s15 = sphi %s1265_s15, %s1460_s15  }
   0x4   : > { %p24_p0 = scmp.ge.s32.totalorder %s23_s20, 2  ;;  %p1009_p1 = scmp.ge.s32.totalorder %s1231_s19, 1 }
   0x5   : > { %p229_p2 = scmp.lt.s32.totalorder %s1231_s19, 5 }
   0x6   : > { %s1465_s20 = smov (%p24_p0, %s23_s20), 0  ;;  %s1467_s21 = smov (!%p24_p0, %s26_s21), %s1227_s18 }
   0x7   : > { %p230_p3 = pnand %p1009_p1, %p229_p2  ;;  %p28_p4 = scmp.ge.s32.totalorder %s1467_s21, 2 }
   0x8   : > { %s1010_s22 = sshll.u32 (!%p230_p3), %s1215_s15, 1  ;;  %p294_p5 = scmp.lt.s32.totalorder (!%p230_p3), %s1219_s16, 1 }
   0x9   : > { %s1469_s21 = smov (%p28_p4, %s1467_s21), 0  ;;  %233 = sbr.rel (%p230_p3) target bundleno = 2842 (0xb1a), region = 36 }
   0xa   : > { %s281_s23 = ssub.s32 (!%p230_p3), 1, %s1010_s22  ;;  %s1459_s1 = sld [smem:[#allocation5_spill]] (!%p230_p3) }
   0xb   : > { %s282_s24 = smul.u32 (!%p230_p3), %s1219_s16, %s281_s23  ;;  %p1021_p8 = scmp.ne.s32.totalorder (!%p230_p3), %s1215_s15, 0 }
   0xd   : > { %s283_s26 = sadd.s32 (!%p230_p3), %s1215_s15, %s282_s24 }
   0xe   : > { %s1303_s25 = scalar_select %p294_p5, %s1219_s16, 1 }
   0xf   : > { %s1011_s27 = sshll.u32 %s283_s26, 1  ;;  %s1018_s12 = sshll.u32 %s283_s26, 2 }
  0x10   : > { %s1051_s28 = sshll.u32 %s1303_s25, 4  ;;  %p285_p6 = scmp.lt.s32.totalorder %s1011_s27, 3 }
  0x11   : > { %s298_s5 = scalar_lea.vmem %s1459_s1, %s1051_s28  ;;  %s1313_s8 = scalar_lea.vmem %s1455_s2, %s1051_s28 }
  0x12   : > { %s306_s11 = scalar_lea.vmem %s1456_s3, %s1303_s25  ;;  %s1471_s27 = smov (!%p285_p6, %s1011_s27), 3 }
  0x13   : > { %s1012_s13 = sshll.u32 %s1471_s27, 2  ;;  %p314_p7 = scmp.lt.s32.totalorder %s1018_s12, 7 }
  0x14   : > { %s288_s23 = scalar_lea.vmem %s1453_s0, %s1012_s13  ;;  %s1019_s24 = sshll.u32 %s1303_s25, 3 }
  0x15   : > { %s1473_s12 = smov (!%p314_p7, %s1018_s12), 7  ;;  %329 = sbr.rel (%p1021_p8) target bundleno = 28 (0x1c), region = 40 }
  0x16   : > { %s317_s29 = sadd.s32 %s1019_s24, %s1473_s12 }
  0x17   : > { %s1020_s30 = sshll.u32 %s317_s29, 1 }
  0x18   : > { %s1326_s28 = scalar_lea.vmem %s1457_s4, %s1020_s30 }
  0x1a   : > { %vm330_vm0 = vcmask 257024   ;;  %v1233_v0 = vmov 0.0  }
  0x1b   : > { %331 = vst.msk [vmem:[#allocation3] sm:$0xf] %vm330_vm0, %v1233_v0  ;;  %332 = vst.msk [vmem:[#allocation4] sm:$0xf] %vm330_vm0, %v1233_v0 }
  0x1c PF: > { %v1156_v1 = vld [vmem:[%s298_s5 + $0x8] sm:$0xff]   ;;  %v1234_v2 = vmov 0.0   ;;  %v1157_v3 = vld [vmem:[%s298_s5] sm:$0xff]   ;;  %vm1235_vm1 = vmmov 0   ;;  %vm363_vm2 = vcmask 261120   ;;  %s1027_s26 = smul.u32 12, %s1219_s16 }
  0x1d   : > { %1069 = vmatprep.subr.bf16.mxu0 %v1234_v2  ;;  %1077 = vmatprep.subr.bf16.mxu1 %v1234_v2  ;;  %v1335_v4 = vld [vmem:[%s1313_s8 + $0x8] sm:$0xff]   ;;  %v1158_v5 = vld [vmem:[%s288_s23] sm:$0xff]   ;;  %s1236_s25 = smov 32   ;;  %s1237_s5 = smov 96   ;;  %vm514_vm3 = vcmask 257024   ;;  %vm535_vm4 = vcmask 254976  }
  0x1e   : > { %1070 = vmatpush3.bf16.msra.mxu0 %v1156_v1  ;;  %1073 = vmatprep.mubr.msk.bf16.mxu0 %vm1235_vm1, %v1234_v2  ;;  %v1341_v6 = vld [vmem:[%s1313_s8] sm:$0xff]   ;;  %s421_s27 = scalar_lea.vmem [#allocation2], %s1027_s26  ;;  %s1238_s7 = smov 64  }
  0x1f   : > { %1071 = vmatprep.subr.bf16.mxu0 %v1234_v2  ;;  %1081 = vmatprep.mubr.msk.bf16.mxu1 %vm1235_vm1, %v1234_v2  ;;  %v1022_v9 = vld [vmem:[%s306_s11] ss:$0 sm:$0xff]  ;;  %s1033_s8 = sshll.u32 %s1219_s16, 2  ;;  %s641_s10 = ssub.s32 2, %s1219_s16 }
  0x20   : > { %1078 = vmatpush3.bf16.msra.mxu1 %v1335_v4  ;;  %s926_s9 = scalar_lea.vmem [#allocation2], %s1033_s8  ;;  %s1039_s11 = sshll.u32 %s641_s10, 2 }
  0x21   : > { %1079 = vmatprep.subr.bf16.mxu1 %v1234_v2  ;;  %s643_s12 = scalar_lea.vmem [#allocation2], %s1039_s11  ;;  %s1043_s13 = smul.u32 4294967284, %s1219_s16 }
  0x22   : > { %v423_v7 = vld [vmem:[#allocation3] sm:$0xf]  ;;  %1072 = vmatpush3.bf16.msra.mxu0 %v1157_v3  ;;  %v488_v23 = vld [vmem:[#allocation4] sm:$0xf]  ;;  %s1053_s22 = smul.u32 6, %s1219_s16  ;;  %s1037_s24 = sshll.u32 %s1219_s16, 1 }
  0x23   : > { %1085 = vmatprep.subr.bf16.mxu0 %v1234_v2  ;;  %v424_v8 = vpack.c.bf16 %v423_v7, %v423_v7  ;;  %s937_s14 = scalar_lea.vmem [#allocation2], %s1043_s13  ;;  %s1042_s29 = sshll.u32 %s641_s10, 1 }
  0x24   : > { %1080 = vmatpush3.bf16.msra.mxu1 %v1341_v6  ;;  %s534_s23 = scalar_lea.vmem %s1326_s28, %s1053_s22  ;;  %s929_s30 = scalar_lea.vmem %s1326_s28, %s1037_s24 }
  0x25   : > { %1074 = vmatmul.mubr.msk.bf16.vlgmr.msra.gmra.mxu0 %vm363_vm2, %v1158_v5  ;;  %1093 = vmatprep.subr.bf16.mxu1 %v1234_v2  ;;  %s743_s6 = scalar_lea.vmem %s1326_s28, %s1042_s29  ;;  %s1047_s1 = smul.u32 4294967290, %s1219_s16 }
  0x26   : > { %1086 = vmatpush3.bf16.msra.mxu0 %v1335_v4  ;;  %1089 = vmatprep.mubr.msk.bf16.mxu0 %vm1235_vm1, %v1234_v2 }
  0x27   : > { %1087 = vmatprep.subr.bf16.mxu0 %v1234_v2  ;;  %1082 = vmatmul.mubr.msk.bf16.vlgmr.msra.gmra.mxu1 %vm363_vm2, %v424_v8  ;;  %s941_s15 = scalar_lea.vmem %s1326_s28, %s1047_s1 }
  0x28   : > { %1094 = vmatpush3.bf16.msra.mxu1 %v1335_v4  ;;  %1097 = vmatprep.mubr.msk.bf16.mxu1 %vm1235_vm1, %v1234_v2 }
  0x29   : > { %1095 = vmatprep.subr.bf16.mxu1 %v1234_v2 }
  0x2a   : > { %1088 = vmatpush3.bf16.msra.mxu0 %v1341_v6 }
  0x2b   : > { %1101 = vmatprep.subr.bf16.mxu0 %v1234_v2 }
  0x2c   : > { %1096 = vmatpush3.bf16.msra.mxu1 %v1341_v6 }
  0xe5   : > { %v401_v10 = vpop.f32.mrf.mxu0 }
  0xe6   : > { %v402_v11 = vadd.f32 %v1022_v9, %v401_v10 }
  0xe7   : > { %v1075_v12 = vpop.f32.mrf.mxu0  ;;  %v474_v13 = vpop.f32.mrf.mxu1 }
  0xe8   : > { %408 = vst [vmem:[#allocation2] sm:$0xff] %v402_v11  }
  0xe9   : > { %v404_v14 = vpop.f32.mrf.mxu0  ;;  %v1083_v16 = vpop.f32.mrf.mxu1 }
  0xea   : > { %v405_v15 = vadd.f32 %v1022_v9, %v404_v14 }
  0xeb   : > { %v1076_v17 = vpop.f32.mrf.mxu0  ;;  %v477_v18 = vpop.f32.mrf.mxu1 }
  0xec   : > { %412 = vst [vmem:[#allocation2 + $0x8] sm:$0xff] %v405_v15  }
  0xed   : > { %v1084_v19 = vpop.f32.mrf.mxu1 }
  0xf3   : > { %v422_v20 = vld [vmem:[%s421_s27] sm:$0xf]  ;;  %v1034_v42 = vld [vmem:[%s926_s9 + $0x4] sm:$0xf] }
  0xf4   : > { %v480_v21 = vadd.f32 %v474_v13, %v422_v20  ;;  %v644_v3 = vld [vmem:[%s643_s12] sm:$0xf] }
  0xf6   : > { %1161 = vtanh.f32 %v480_v21  ;;  %v1031_v24 = vmul.f32 -1.442695, %v480_v21 }
  0xf8   : > { %1163 = vpow2.f32 %v1031_v24 }
 0x103   : > { %v1162_v22 = vpop.eup %1161 }
 0x104   : > { %495 = vrot.lane.b32.xlu0 %v1162_v22, %s1236_s25 }
 0x105   : > { %v1164_v25 = vpop.eup %1163 }
 0x106   : > { %v484_v26 = vadd.f32 1.0, %v1164_v25 }
 0x108   : > { %490 = vrot.lane.b32.xlu0 %v488_v23, %s1236_s25  ;;  %1165 = vrcp.f32 %v484_v26 }
 0x115   : > { %v1166_v27 = vpop.eup %1165 }
 0x176   : > { %v496_v28 = vpop.permute.xlu0 %495 }
 0x177   : > { %v498_v29 = vmul.f32 %v1166_v27, %v496_v28  ;;  %v1044_v28 = vld [vmem:[%s937_s14 + $0xc] sm:$0xf] }
 0x179   : > { %500 = vrot.lane.b32.xlu1 %v498_v29, %s1236_s25 }
 0x17a   : > { %v491_v30 = vpop.permute.xlu0 %490 }
 0x17b   : > { %v493_v31 = vmul.f32 %v1166_v27, %v491_v30 }
 0x1eb   : > { %v501_v32 = vpop.permute.xlu1 %500 }
 0x1ec   : > { %v503_v33 = vadd.f32 %v501_v32, %v493_v31 }
 0x1ee   : > { %1167 = vtanh.f32 %v503_v33 }
 0x1fb   : > { %v1168_v34 = vpop.eup %1167 }
 0x1fc   : > { %506 = vrot.lane.b32.xlu1 %v1168_v34, %s1236_s25 }
 0x200   : > { %511 = vrot.lane.b32.xlu1 %v503_v33, %s1237_s5 }
 0x26e   : > { %v507_v35 = vpop.permute.xlu1 %506 }
 0x26f   : > { %v1371_v36 = vmul.f32 %v1166_v27, %v507_v35 }
 0x271   : > { %517 = vrot.lane.b32.xlu0 %v1371_v36, %s1238_s7 }
 0x272   : > { %v512_v37 = vpop.permute.xlu1 %511 }
 0x273   : > { %515 = vst.msk [vmem:[#allocation4] sm:$0xf] %vm514_vm3, %v512_v37 }
 0x27a   : > { %v594_v38 = vld [vmem:[#allocation4] sm:$0xf] }
 0x27b   : > { %596 = vrot.lane.b32.xlu1 %v594_v38, %s1236_s25 }
 0x2e3   : > { %v518_v39 = vpop.permute.xlu0 %517 }
 0x2e4   : > { %520 = vst.msk [vmem:[#allocation3] sm:$0xf] %vm514_vm3, %v518_v39  ;;  %v1239_v39 = vmov 1983009808  }
 0x2eb   : > { %v541_v40 = vld [vmem:[#allocation3] sm:$0xf] }
 0x2ec   : > { %v542_v41 = vpack.c.bf16 %v541_v40, %v541_v40  ;;  %v524_v40 = vunpack.c.l.s4 %v1239_v39 }
 0x2ed   : > { %v597_v55 = vpop.permute.xlu1 %596 }
 0x2ee   : > { %1090 = vmatmul.mubr.msk.bf16.vlgmr.msra.gmra.mxu0 %vm363_vm2, %v542_v41  ;;  %v526_v41 = vlaneseq }
 0x2ef   : > { %1102 = vmatpush3.bf16.msra.mxu0 %v1335_v4  ;;  %1105 = vmatprep.mubr.msk.bf16.mxu0 %vm1235_vm1, %v1234_v2 }
 0x2f0   : > { %1103 = vmatprep.subr.bf16.mxu0 %v1234_v2 }
 0x2f3   : > { %1104 = vmatpush3.bf16.msra.mxu0 %v1341_v6 }
 0x3ae   : > { %v580_v43 = vpop.f32.mrf.mxu0 }
 0x3af   : > { %v586_v44 = vadd.f32 %v1034_v42, %v580_v43  ;;  %v525_v42 = vunpack.c.0.s8 %v524_v40  ;;  %v527_v43 = vshrl.u32 %v526_v41, 7 }
 0x3b0   : > { %v1091_v45 = vpop.f32.mrf.mxu0 }
 0x3b1   : > { %1169 = vtanh.f32 %v586_v44  ;;  %v1036_v49 = vmul.f32 -1.442695, %v586_v44 }
 0x3b2   : > { %v583_v46 = vpop.f32.mrf.mxu0 }
 0x3b3   : > { %1171 = vpow2.f32 %v1036_v49  ;;  %v521_v46 = vpack.c.bf16 %v1371_v36, %v1371_v36 }
 0x3b4   : > { %v1092_v47 = vpop.f32.mrf.mxu0 }
 0x3be   : > { %v1170_v48 = vpop.eup %1169 }
 0x3bf   : > { %601 = vrot.lane.b32.xlu0 %v1170_v48, %s1236_s25  ;;  %v528_v48 = vsub.s32 %v525_v42, %v527_v43 }
 0x3c0   : > { %v1172_v50 = vpop.eup %1171 }
 0x3c1   : > { %v590_v51 = vadd.f32 1.0, %v1172_v50  ;;  %v529_v50 = vrot.slane %v521_v46, %v528_v48 }
 0x3c3   : > { %1173 = vrcp.f32 %v590_v51 }
 0x3d0   : > { %v1174_v52 = vpop.eup %1173 }
 0x3d1   : > { %v599_v56 = vmul.f32 %v1174_v52, %v597_v55 }
 0x431   : > { %v602_v53 = vpop.permute.xlu0 %601 }
 0x432   : > { %v604_v54 = vmul.f32 %v1174_v52, %v602_v53 }
 0x434   : > { %606 = vrot.lane.b32.xlu0 %v604_v54, %s1236_s25 }
 0x4a6   : > { %v607_v57 = vpop.permute.xlu0 %606 }
 0x4a7   : > { %v609_v58 = vadd.f32 %v607_v57, %v599_v56 }
 0x4a9   : > { %1175 = vtanh.f32 %v609_v58 }
 0x4b6   : > { %v1176_v59 = vpop.eup %1175 }
 0x4b7   : > { %612 = vrot.lane.b32.xlu1 %v1176_v59, %s1236_s25 }
 0x4bb   : > { %617 = vrot.lane.b32.xlu1 %v609_v58, %s1237_s5 }
 0x529   : > { %v613_v60 = vpop.permute.xlu1 %612 }
 0x52a   : > { %v1389_v61 = vmul.f32 %v1174_v52, %v613_v60 }
 0x52c   : > { %622 = vrot.lane.b32.xlu0 %v1389_v61, %s1238_s7  ;;  %v626_v56 = vpack.c.bf16 %v1389_v61, %v1389_v61 }
 0x52d   : > { %v618_v62 = vpop.permute.xlu1 %617 }
 0x52e   : > { %620 = vst.msk [vmem:[#allocation4] sm:$0xf] %vm514_vm3, %v618_v62  ;;  %v634_v58 = vrot.slane %v626_v56, %v528_v48 }
 0x535   : > { %v698_v63 = vld [vmem:[#allocation4] sm:$0xf] }
 0x536   : > { %700 = vrot.lane.b32.xlu1 %v698_v63, %s1236_s25 }
 0x59e   : > { %v623_v0 = vpop.permute.xlu0 %622 }
 0x59f   : > { %625 = vst.msk [vmem:[#allocation3] sm:$0xf] %vm514_vm3, %v623_v0 }
 0x5a6   : > { %v645_v1 = vld [vmem:[#allocation3] sm:$0xf] }
 0x5a7   : > { %v646_v2 = vpack.c.bf16 %v645_v1, %v645_v1 }
 0x5a8   : > { %v701_v16 = vpop.permute.xlu1 %700 }
 0x5a9   : > { %1098 = vmatmul.mubr.msk.bf16.vlgmr.msra.gmra.mxu1 %vm363_vm2, %v646_v2 }
 0x669   : > { %v684_v4 = vpop.f32.mrf.mxu1 }
 0x66a   : > { %v690_v5 = vadd.f32 %v684_v4, %v644_v3 }
 0x66b   : > { %v1099_v6 = vpop.f32.mrf.mxu1 }
 0x66c   : > { %1177 = vtanh.f32 %v690_v5  ;;  %v1041_v10 = vmul.f32 -1.442695, %v690_v5 }
 0x66d   : > { %v687_v7 = vpop.f32.mrf.mxu1 }
 0x66e   : > { %1179 = vpow2.f32 %v1041_v10 }
 0x66f   : > { %v1100_v8 = vpop.f32.mrf.mxu1 }
 0x679   : > { %v1178_v9 = vpop.eup %1177 }
 0x67a   : > { %705 = vrot.lane.b32.xlu0 %v1178_v9, %s1236_s25 }
 0x67b   : > { %v1180_v11 = vpop.eup %1179 }
 0x67c   : > { %v694_v12 = vadd.f32 1.0, %v1180_v11 }
 0x67e   : > { %1181 = vrcp.f32 %v694_v12 }
 0x68b   : > { %v1182_v13 = vpop.eup %1181 }
 0x68c   : > { %v703_v17 = vmul.f32 %v1182_v13, %v701_v16 }
 0x6ec   : > { %v706_v14 = vpop.permute.xlu0 %705 }
 0x6ed   : > { %v708_v15 = vmul.f32 %v1182_v13, %v706_v14 }
 0x6ef   : > { %710 = vrot.lane.b32.xlu0 %v708_v15, %s1236_s25 }
 0x761   : > { %v711_v18 = vpop.permute.xlu0 %710 }
 0x762   : > { %v713_v19 = vadd.f32 %v711_v18, %v703_v17 }
 0x764   : > { %1183 = vtanh.f32 %v713_v19 }
 0x771   : > { %v1184_v20 = vpop.eup %1183 }
 0x772   : > { %716 = vrot.lane.b32.xlu1 %v1184_v20, %s1236_s25 }
 0x776   : > { %721 = vrot.lane.b32.xlu1 %v713_v19, %s1237_s5 }
 0x7e4   : > { %v717_v21 = vpop.permute.xlu1 %716 }
 0x7e5   : > { %v719_v22 = vmul.f32 %v1182_v13, %v717_v21 }
 0x7e7   : > { %726 = vrot.lane.b32.xlu0 %v719_v22, %s1238_s7  ;;  %v730_v49 = vpack.c.bf16 %v719_v22, %v719_v22 }
 0x7e8   : > { %v722_v23 = vpop.permute.xlu1 %721 }
 0x7e9   : > { %724 = vst.msk [vmem:[#allocation4] sm:$0xf] %vm514_vm3, %v722_v23  ;;  %v738_v51 = vrot.slane %v730_v49, %v528_v48 }
 0x7f0   : > { %v803_v24 = vld [vmem:[#allocation4] sm:$0xf] }
 0x7f1   : > { %805 = vrot.lane.b32.xlu1 %v803_v24, %s1236_s25 }
 0x859   : > { %v727_v25 = vpop.permute.xlu0 %726 }
 0x85a   : > { %729 = vst.msk [vmem:[#allocation3] sm:$0xf] %vm514_vm3, %v727_v25 }
 0x861   : > { %v750_v26 = vld [vmem:[#allocation3] sm:$0xf] }
 0x862   : > { %v751_v27 = vpack.c.bf16 %v750_v26, %v750_v26 }
 0x863   : > { %v806_v52 = vpop.permute.xlu1 %805 }
 0x864   : > { %1106 = vmatmul.mubr.msk.bf16.vlgmr.msra.gmra.mxu0 %vm363_vm2, %v751_v27 }
 0x924   : > { %v789_v29 = vpop.f32.mrf.mxu0 }
 0x925   : > { %v795_v30 = vadd.f32 %v1044_v28, %v789_v29 }
 0x926   : > { %v1107_v31 = vpop.f32.mrf.mxu0 }
 0x927   : > { %1185 = vtanh.f32 %v795_v30  ;;  %v1046_v35 = vmul.f32 -1.442695, %v795_v30 }
 0x928   : > { %v792_v32 = vpop.f32.mrf.mxu0 }
 0x929   : > { %1187 = vpow2.f32 %v1046_v35 }
 0x92a   : > { %v1108_v33 = vpop.f32.mrf.mxu0 }
 0x934   : > { %v1186_v34 = vpop.eup %1185 }
 0x935   : > { %810 = vrot.lane.b32.xlu0 %v1186_v34, %s1236_s25 }
 0x936   : > { %v1188_v37 = vpop.eup %1187 }
 0x937   : > { %v799_v38 = vadd.f32 1.0, %v1188_v37 }
 0x939   : > { %1189 = vrcp.f32 %v799_v38 }
 0x946   : > { %v1190_v44 = vpop.eup %1189 }
 0x947   : > { %v808_v53 = vmul.f32 %v1190_v44, %v806_v52 }
 0x9a7   : > { %v811_v45 = vpop.permute.xlu0 %810 }
 0x9a8   : > { %v813_v47 = vmul.f32 %v1190_v44, %v811_v45 }
 0x9aa   : > { %815 = vrot.lane.b32.xlu0 %v813_v47, %s1236_s25 }
 0x9ae   : > { %530 = vrot.lane.b32.xlu0 %v529_v50, %s1238_s7 }
 0x9b2   : > { %739 = vrot.lane.b32.xlu0 %v738_v51, %s1238_s7 }
 0xa1c   : > { %v816_v54 = vpop.permute.xlu0 %815 }
 0xa1d   : > { %v818_v55 = vadd.f32 %v816_v54, %v808_v53 }
 0xa1f   : > { %1191 = vtanh.f32 %v818_v55 }
 0xa20   : > { %v531_v36 = vpop.permute.xlu0 %530 }
 0xa21   : > { %536 = vst.msk [vmem:[%s534_s23] sm:$0x3] %vm535_vm4, %v531_v36 }
 0xa24   : > { %v740_v63 = vpop.permute.xlu0 %739 }
 0xa2c   : > { %v1192_v57 = vpop.eup %1191 }
 0xa2d   : > { %821 = vrot.lane.b32.xlu1 %v1192_v57, %s1236_s25 }
 0xa31   : > { %635 = vrot.lane.b32.xlu1 %v634_v58, %s1238_s7 }
 0xa35   : > { %826 = vrot.lane.b32.xlu1 %v818_v55, %s1237_s5 }
 0xa9f   : > { %v822_v59 = vpop.permute.xlu1 %821 }
 0xaa0   : > { %v824_v60 = vmul.f32 %v1190_v44, %v822_v59 }
 0xaa2   : > { %v835_v62 = vpack.c.bf16 %v824_v60, %v824_v60  ;;  %831 = vrot.lane.b32.xlu0 %v824_v60, %s1238_s7 }
 0xaa3   : > { %v636_v61 = vpop.permute.xlu1 %635 }
 0xaa4   : > { %1038 = vst.msk [vmem:[%s929_s30 + $0x2] sm:$0x3] %vm535_vm4, %v636_v61  ;;  %v843_v0 = vrot.slane %v835_v62, %v528_v48 }
 0xaa5   : > { %744 = vst.msk [vmem:[%s743_s6] sm:$0x3] %vm535_vm4, %v740_v63 }
 0xaa6   : > { %844 = vrot.lane.b32.xlu1 %v843_v0, %s1238_s7 }
 0xaa7   : > { %v827_v1 = vpop.permute.xlu1 %826 }
 0xaa8   : > { %829 = vst.msk [vmem:[#allocation4] sm:$0xf] %vm514_vm3, %v827_v1 }
 0xb14   : > { %v832_v2 = vpop.permute.xlu0 %831 }
 0xb15   : > { %834 = vst.msk [vmem:[#allocation3] sm:$0xf] %vm514_vm3, %v832_v2 }
 0xb18   : > { %v845_v3 = vpop.permute.xlu1 %844 }
 0xb19   : > { %1048 = vst.msk [vmem:[%s941_s15 + $0x6] sm:$0x3] %vm535_vm4, %v845_v3 }
 0xb1a PF: > { %s14_s19 = sadd.s32 1, %s1231_s19   ;;  %s1460_s15 = smov %s1223_s17 }
 0xb1b   : > { %p11_p9 = scmp.ge.s32.totalorder %s14_s19, 6   ;;  %s1461_s16 = smov %s1227_s18 }
 0xb1c   : > { %s1462_s17 = smov %s1465_s20  ;;  %s1463_s18 = smov %s1469_s21 }
 0xb1d   :  { %13 = sbr.rel (!%p11_p9) target bundleno = 3 (0x3), region = 90 }

// kernel: model_forward.9
= control target key start
LH: loop header
LB: loop body
LE: loop exit
PB: predicated region body
PF: predicated region fallthrough
CT: control target
= control target key end

     0   :  { %v170_v1 = vmov 0.0   ;;  %vm171_vm0 = vmmov 0   ;;  %s215_s0 = inlined_call_operand.vmem [shape: bf16[4,64], index: 0, kind: input, shape index: {}]   ;;  %s216_s1 = inlined_call_operand.vmem [shape: bf16[64,64], index: 1, kind: input, shape index: {}]   ;;  %s217_s2 = inlined_call_operand.vmem [shape: f32[1,64], index: 2, kind: input, shape index: {}]   ;;  %s218_s3 = inlined_call_operand.hbm [shape: f32[4,64], index: 3, kind: output, shape index: {}]  }
   0x1   :  { %v144_v0 = vld [vmem:[%s216_s1 + $0x18] sm:$0xff]   ;;  %128 = vmatprep.subr.bf16.mxu0 %v170_v1  ;;  %v145_v2 = vld [vmem:[%s216_s1 + $0x10] sm:$0xff]   ;;  %136 = vmatprep.mubr.msk.bf16.mxu0 %vm171_vm0, %v170_v1 }
   0x2   :  { %129 = vmatpush3.bf16.msra.mxu0 %v144_v0 }
   0x3   :  { %130 = vmatprep.subr.bf16.mxu0 %v170_v1 }
   0x4   :  { %8 = vsyncpa [#allocation3], 0  ;;  %v146_v3 = vld [vmem:[%s216_s1 + $0x8] sm:$0xff]   ;;  %v147_v4 = vld [vmem:[%s216_s1] sm:$0xff]   ;;  %v172_v6 = vmov 0   ;;  %vm57_vm1 = vcmask 523264  }
   0x5   :  { %v16_v5 = vld [vmem:[%s215_s0] sm:$0x3]  ;;  %s173_s24 = smov [#allocation2]   ;;  %vm101_vm2 = vcmask 519168  }
   0x6   :  { %131 = vmatpush3.bf16.msra.mxu0 %v145_v2  ;;  %v17_v7 = vmax.bf16 %v172_v6, %v16_v5  ;;  %v117_v8 = vld [vmem:[%s217_s2] ss:$0 sm:$0xff]  ;;  %s109_s25 = sshll.u32 %s173_s24, 4  ;;  %s110_s25 = int_to_ptr.vmem [resolvable:$true] %s109_s25 }
   0x7   :  { %132 = vmatprep.subr.bf16.mxu0 %v170_v1  ;;  %s148_s0 = scalar_lea.vmem %s110_s25, 64  ;;  %p153_p1 = scmp.lt.s32.totalorder %s110_s25, %s110_s25 }
   0x8   :  { %p149_p0 = scmp.ne.s32.totalorder %s110_s25, %s148_s0  ;;  %p154_p2 = scmp.lt.s32.totalorder %s148_s0, %s148_s0 }
   0xa   :  { %133 = vmatpush3.bf16.msra.mxu0 %v146_v3  ;;  %p155_p3 = por %p154_p2, %p153_p1 }
   0xb   :  { %134 = vmatprep.subr.bf16.mxu0 %v170_v1 }
   0xc   :  { %p156_p4 = pnand %p155_p3, %p149_p0 }
   0xe   :  { %135 = vmatpush3.bf16.msra.mxu0 %v147_v4 }
  0x11   :  { %137 = vmatmul.mubr.msk.bf16.vlgmr.msra.gmra.mxu0 %vm57_vm1, %v17_v7 }
  0xd1   :  { %v95_v9 = vpop.f32.mrf.mxu0 }
  0xd2   :  { %v96_v10 = vadd.f32 %v117_v8, %v95_v9 }
  0xd3   :  { %v138_v11 = vpop.f32.mrf.mxu0 }
  0xd4   :  { %102 = vst.msk [vmem:[#allocation2] sm:$0xf] %vm101_vm2, %v96_v10 }
  0xd5   :  { %v98_v12 = vpop.f32.mrf.mxu0 }
  0xd6   :  { %159 = shalt.err (!%p156_p4)
}
  0xd7   :  { %112 = dma.vmem_to_hbm [thread:$0]  %s110_s25, 64, %s218_s3, [#allocation3]   ;;  %v139_v13 = vpop.f32.mrf.mxu0 }
  0xd8   :  { %168 = dma.done.wait [#allocation3], 64  }
  0xd9   :  { %169 = vsyncadd [#allocation3], 4294967232 }
  0xda   :  { %116 = vsyncpa [#allocation3], 1 }

</bundles_post_ra>
